<compile_context>
chip_gen: v6e
topology: v6e:2x2x1
jax: 0.10.0
libtpu: 0.0.40
codegen_flags: <defaults>
</compile_context>

<pallas_src>
import jax
import jax.numpy as jnp
from jax.experimental import pallas as pl
from jax.experimental.pallas import tpu as pltpu


def _round_up(a, m):
    return ((a + m - 1) // m) * m


def _mlp_softmax_T(xT, w1T_ref, b1T_ref, w2_ref, b2T_ref):
    """Linear(D_in,H) -> ReLU -> Linear(H,D_out) -> Softmax, batch-on-lanes.

    xT:      [D_in, TB]  activations (batch on the lane axis)
    w1T_ref: [H, D_in]   first-layer weight, pre-transposed
    b1T_ref: [H, 1]
    w2_ref:  [H, D_out]  second-layer weight (original layout)
    b2T_ref: [D_out, 1]
    returns  [D_out, TB] softmax probabilities (softmax over D_out).
    """
    d_in = w1T_ref.shape[1]
    d_out = w2_ref.shape[1]

    # First layer as a rank-D_in outer-product update: pure VPU, no MXU pad.
    acc = w1T_ref[:, 0:1] * xT[0:1, :]                        # [H, TB]
    for d in range(1, d_in):
        acc = acc + w1T_ref[:, d:d + 1] * xT[d:d + 1, :]
    hT = jnp.maximum(acc + b1T_ref[...], 0.0)                 # [H, TB]

    if d_out == 2:
        # 2-class softmax == sigmoid(logit0 - logit1); halves the multiply +
        # sublane-reduce work and the EUP exp pushes, removes max/sum/divide.
        dw = w2_ref[:, 0:1] - w2_ref[:, 1:2]                  # [H, 1]
        db = b2T_ref[0:1, :] - b2T_ref[1:2, :]                # [1, 1]
        ld = jnp.sum(hT * dw, axis=0, keepdims=True) + db     # [1, TB]
        p0 = pl.reciprocal(1.0 + jnp.exp(-ld), approx=False)  # exact: 1e-5 tol
        return jnp.concatenate([p0, 1.0 - p0], axis=0)        # [2, TB]

    # General path: per-output-column multiply + sublane (XLU) reduction,
    # then a max-subtracted softmax over the D_out sublanes.
    cols = [jnp.sum(hT * w2_ref[:, j:j + 1], axis=0, keepdims=True)
            for j in range(d_out)]
    logitsT = jnp.concatenate(cols, axis=0) + b2T_ref[...]    # [D_out, TB]
    m = jnp.max(logitsT, axis=0, keepdims=True)
    e = jnp.exp(logitsT - m)
    inv = pl.reciprocal(jnp.sum(e, axis=0, keepdims=True), approx=False)
    return e * inv


def coae_kernel(xT_ref,
                w1eT_ref, b1eT_ref, w2e_ref, b2eT_ref,
                w1dT_ref, b1dT_ref, w2d_ref, b2dT_ref,
                out_ref):
    xT = xT_ref[...]                                           # [D, TB]
    zT = _mlp_softmax_T(xT, w1eT_ref, b1eT_ref, w2e_ref, b2eT_ref)
    decT = _mlp_softmax_T(zT, w1dT_ref, b1dT_ref, w2d_ref, b2dT_ref)
    # Packed lane-dense output slab [dec | z]: one unmasked store / one DMA.
    out_ref[...] = jnp.concatenate([decT, zT], axis=0)         # [2D, TB]


def coae_forward(x, params):
    """Full CoAE forward pass in a single Pallas kernel.

    x:      [B, D] float32
    params: dict with w1e [D,H], b1e [1,H], w2e [H,D], b2e [1,D],
                       w1d [D,H], b1d [1,H], w2d [H,D], b2d [1,D]
    returns (decoded [B,D], z [B,D])
    """
    B, D = x.shape
    H = params["w1e"].shape[1]

    # Transposed-layout weights (wrapper-side layout plumbing, done once).
    w1eT, b1eT = jnp.transpose(params["w1e"]), jnp.transpose(params["b1e"])
    w2e, b2eT = params["w2e"], jnp.transpose(params["b2e"])
    w1dT, b1dT = jnp.transpose(params["w1d"]), jnp.transpose(params["b1d"])
    w2d, b2dT = params["w2d"], jnp.transpose(params["b2d"])

    # Batch is the lane axis.  Single full-extent block for small B; else
    # lane-aligned tiles (<=4096) with >=2 tiles so v7x's 2 TCs both work.
    if B <= 1024:
        tile_b, b_pad = B, B
    else:
        n_tiles = max(2, pl.cdiv(B, 4096))
        tile_b = _round_up(pl.cdiv(B, n_tiles), 128)
        b_pad = tile_b * n_tiles

    xT = jnp.transpose(x)                                      # [D, B]
    if b_pad != B:
        xT = jnp.pad(xT, ((0, 0), (0, b_pad - B)))

    grid = (b_pad // tile_b,)

    def full_spec(a):
        # Whole array as one block; constant index_map -> stays VMEM-resident.
        return pl.BlockSpec(a.shape, lambda i: (0, 0))

    weights = (w1eT, b1eT, w2e, b2eT, w1dT, b1dT, w2d, b2dT)
    in_specs = [pl.BlockSpec((D, tile_b), lambda i: (0, i))]
    in_specs += [full_spec(a) for a in weights]
    out_specs = pl.BlockSpec((2 * D, tile_b), lambda i: (0, i))

    packedT = pl.pallas_call(
        coae_kernel,
        out_shape=jax.ShapeDtypeStruct((2 * D, b_pad), jnp.float32),
        grid=grid,
        in_specs=in_specs,
        out_specs=out_specs,
        compiler_params=pltpu.CompilerParams(
            dimension_semantics=("parallel",),   # shard batch tiles over TCs
            vmem_limit_bytes=32 << 20,           # tiny footprint, safe on all
        ),
    )(xT, *weights)

    dec = jnp.transpose(packedT[:D, :B])
    z = jnp.transpose(packedT[D:, :B])
    return dec, z


def init_coae_params(key, input_dim=2, encode_dim=None):
    """Deterministic synthetic parameter init (PyTorch-Linear-like scaling)."""
    if encode_dim is None:
        encode_dim = (6 * input_dim) ** 2
    D, H = input_dim, encode_dim
    ks = jax.random.split(key, 8)

    def lin(kw, kb, fan_in, fan_out):
        bound = 1.0 / jnp.sqrt(fan_in)
        w = jax.random.uniform(kw, (fan_in, fan_out), jnp.float32, -bound, bound)
        b = jax.random.uniform(kb, (1, fan_out), jnp.float32, -bound, bound)
        return w, b

    w1e, b1e = lin(ks[0], ks[1], D, H)
    w2e, b2e = lin(ks[2], ks[3], H, D)
    w1d, b1d = lin(ks[4], ks[5], D, H)
    w2d, b2d = lin(ks[6], ks[7], H, D)
    return dict(w1e=w1e, b1e=b1e, w2e=w2e, b2e=b2e,
                w1d=w1d, b1d=b1d, w2d=w2d, b2d=b2d)


def coae_reference(x, p):
    """Pure-JAX reference for correctness checking (full-f32 matmuls)."""
    hp = jax.lax.Precision.HIGHEST
    h = jnp.maximum(jnp.dot(x, p["w1e"], precision=hp) + p["b1e"], 0.0)
    z = jax.nn.softmax(jnp.dot(h, p["w2e"], precision=hp) + p["b2e"], axis=1)
    h2 = jnp.maximum(jnp.dot(z, p["w1d"], precision=hp) + p["b1d"], 0.0)
    dec = jax.nn.softmax(jnp.dot(h2, p["w2d"], precision=hp) + p["b2d"], axis=1)
    return dec, z


if __name__ == "__main__":
    key = jax.random.PRNGKey(0)
    k_x, k_p, k_x2 = jax.random.split(key, 3)

    input_dim = 2                      # CoAE default
    encode_dim = (6 * input_dim) ** 2  # 144
    params = init_coae_params(k_p, input_dim, encode_dim)

    # Small batch: single full-extent block.
    x = jax.random.normal(k_x, (8, input_dim), jnp.float32)
    dec, z = coae_forward(x, params)
    dec, z = jax.block_until_ready(dec), jax.block_until_ready(z)
    dec_ref, z_ref = coae_reference(x, params)
    assert jnp.allclose(z, z_ref, atol=1e-5, rtol=1e-5), "encoder mismatch (small)"
    assert jnp.allclose(dec, dec_ref, atol=1e-5, rtol=1e-5), "decoder mismatch (small)"
    assert jnp.allclose(jnp.sum(z, axis=1), 1.0, atol=1e-5)
    assert jnp.allclose(jnp.sum(dec, axis=1), 1.0, atol=1e-5)

    # Larger, non-tile-aligned batch: exercises the gridded / padded path
    # (2 lane-aligned tiles of 768, 36 padded columns sliced off).
    x2 = jax.random.normal(k_x2, (1500, input_dim), jnp.float32)
    dec2, z2 = coae_forward(x2, params)
    dec2, z2 = jax.block_until_ready(dec2), jax.block_until_ready(z2)
    dec2_ref, z2_ref = coae_reference(x2, params)
    assert jnp.allclose(z2, z2_ref, atol=1e-5, rtol=1e-5), "encoder mismatch (large)"
    assert jnp.allclose(dec2, dec2_ref, atol=1e-5, rtol=1e-5), "decoder mismatch (large)"

    print("KERNEL_OK")
</pallas_src>

<mosaic_0001>
module attributes {stable_mosaic.version = 11 : i64} {
  func.func @coae_kernel(%arg0: i32, %arg1: memref<2x8xf32, #tpu.memory_space<vmem>>, %arg2: memref<144x2xf32, #tpu.memory_space<vmem>>, %arg3: memref<144x1xf32, #tpu.memory_space<vmem>>, %arg4: memref<144x2xf32, #tpu.memory_space<vmem>>, %arg5: memref<2x1xf32, #tpu.memory_space<vmem>>, %arg6: memref<144x2xf32, #tpu.memory_space<vmem>>, %arg7: memref<144x1xf32, #tpu.memory_space<vmem>>, %arg8: memref<144x2xf32, #tpu.memory_space<vmem>>, %arg9: memref<2x1xf32, #tpu.memory_space<vmem>>, %arg10: memref<4x8xf32, #tpu.memory_space<vmem>>) attributes {dimension_semantics = [#tpu.dimension_semantics<parallel>], iteration_bounds = array<i64: 1>, scalar_prefetch = 0 : i64, scratch_operands = 0 : i64, tpu.core_type = #tpu.core_type<tc>, window_params = [{transform_indices = @transform_0, window_bounds = array<i64: 2, 8>}, {pipeline_mode = #tpu.pipeline_mode<synchronous>, transform_indices = @transform_1, window_bounds = array<i64: 144, 2>}, {pipeline_mode = #tpu.pipeline_mode<synchronous>, transform_indices = @transform_2, window_bounds = array<i64: 144, 1>}, {pipeline_mode = #tpu.pipeline_mode<synchronous>, transform_indices = @transform_3, window_bounds = array<i64: 144, 2>}, {pipeline_mode = #tpu.pipeline_mode<synchronous>, transform_indices = @transform_4, window_bounds = array<i64: 2, 1>}, {pipeline_mode = #tpu.pipeline_mode<synchronous>, transform_indices = @transform_5, window_bounds = array<i64: 144, 2>}, {pipeline_mode = #tpu.pipeline_mode<synchronous>, transform_indices = @transform_6, window_bounds = array<i64: 144, 1>}, {pipeline_mode = #tpu.pipeline_mode<synchronous>, transform_indices = @transform_7, window_bounds = array<i64: 144, 2>}, {pipeline_mode = #tpu.pipeline_mode<synchronous>, transform_indices = @transform_8, window_bounds = array<i64: 2, 1>}, {transform_indices = @transform_9, window_bounds = array<i64: 4, 8>}]} {
    %c0 = arith.constant 0 : index
    %c0_0 = arith.constant 0 : index
    %0 = vector.load %arg1[%c0, %c0_0] : memref<2x8xf32, #tpu.memory_space<vmem>>, vector<2x8xf32>
    %c0_1 = arith.constant 0 : index
    %c0_2 = arith.constant 0 : index
    %1 = vector.load %arg2[%c0_1, %c0_2] : memref<144x2xf32, #tpu.memory_space<vmem>>, vector<144x1xf32>
    %2 = vector.extract_strided_slice %0 {offsets = [0, 0], sizes = [1, 8], strides = [1, 1]} : vector<2x8xf32> to vector<1x8xf32>
    %3 = vector.broadcast %1 : vector<144x1xf32> to vector<144x8xf32>
    %4 = vector.broadcast %2 : vector<1x8xf32> to vector<144x8xf32>
    %5 = arith.mulf %3, %4 : vector<144x8xf32>
    %c0_3 = arith.constant 0 : index
    %c1 = arith.constant 1 : index
    %6 = vector.load %arg2[%c0_3, %c1] : memref<144x2xf32, #tpu.memory_space<vmem>>, vector<144x1xf32>
    %7 = vector.extract_strided_slice %0 {offsets = [1, 0], sizes = [1, 8], strides = [1, 1]} : vector<2x8xf32> to vector<1x8xf32>
    %8 = vector.broadcast %6 : vector<144x1xf32> to vector<144x8xf32>
    %9 = vector.broadcast %7 : vector<1x8xf32> to vector<144x8xf32>
    %10 = arith.mulf %8, %9 : vector<144x8xf32>
    %11 = arith.addf %5, %10 : vector<144x8xf32>
    %c0_4 = arith.constant 0 : index
    %c0_5 = arith.constant 0 : index
    %12 = vector.load %arg3[%c0_4, %c0_5] : memref<144x1xf32, #tpu.memory_space<vmem>>, vector<144x1xf32>
    %13 = vector.broadcast %12 : vector<144x1xf32> to vector<144x8xf32>
    %14 = arith.addf %11, %13 : vector<144x8xf32>
    %cst = arith.constant 0.000000e+00 : f32
    %15 = vector.broadcast %cst : f32 to vector<144x8xf32>
    %16 = arith.maximumf %14, %15 : vector<144x8xf32>
    %c0_6 = arith.constant 0 : index
    %c0_7 = arith.constant 0 : index
    %17 = vector.load %arg4[%c0_6, %c0_7] : memref<144x2xf32, #tpu.memory_space<vmem>>, vector<144x1xf32>
    %c0_8 = arith.constant 0 : index
    %c1_9 = arith.constant 1 : index
    %18 = vector.load %arg4[%c0_8, %c1_9] : memref<144x2xf32, #tpu.memory_space<vmem>>, vector<144x1xf32>
    %19 = arith.subf %17, %18 : vector<144x1xf32>
    %c0_10 = arith.constant 0 : index
    %c0_11 = arith.constant 0 : index
    %20 = vector.load %arg5[%c0_10, %c0_11] : memref<2x1xf32, #tpu.memory_space<vmem>>, vector<1x1xf32>
    %c1_12 = arith.constant 1 : index
    %c0_13 = arith.constant 0 : index
    %21 = vector.load %arg5[%c1_12, %c0_13] : memref<2x1xf32, #tpu.memory_space<vmem>>, vector<1x1xf32>
    %22 = arith.subf %20, %21 : vector<1x1xf32>
    %23 = vector.broadcast %19 : vector<144x1xf32> to vector<144x8xf32>
    %24 = arith.mulf %16, %23 : vector<144x8xf32>
    %cst_14 = arith.constant dense<0.000000e+00> : vector<8xf32>
    %25 = vector.multi_reduction <add>, %24, %cst_14 [0] : vector<144x8xf32> to vector<8xf32>
    %26 = vector.shape_cast %25 : vector<8xf32> to vector<1x8xf32>
    %27 = vector.broadcast %22 : vector<1x1xf32> to vector<1x8xf32>
    %28 = arith.addf %26, %27 : vector<1x8xf32>
    %cst_15 = arith.constant 0.000000e+00 : f32
    %29 = vector.broadcast %cst_15 : f32 to vector<1x8xf32>
    %30 = arith.subf %29, %28 : vector<1x8xf32>
    %31 = math.exp %30 : vector<1x8xf32>
    %cst_16 = arith.constant 1.000000e+00 : f32
    %32 = vector.broadcast %cst_16 : f32 to vector<1x8xf32>
    %33 = arith.addf %32, %31 : vector<1x8xf32>
    %34 = tpu.reciprocal %33 : vector<1x8xf32> -> vector<1x8xf32>
    %cst_17 = arith.constant 1.000000e+00 : f32
    %35 = vector.broadcast %cst_17 : f32 to vector<1x8xf32>
    %36 = arith.subf %35, %34 : vector<1x8xf32>
    %37 = tpu.concatenate %34, %36 in 0 : vector<1x8xf32>, vector<1x8xf32> -> vector<2x8xf32>
    %c0_18 = arith.constant 0 : index
    %c0_19 = arith.constant 0 : index
    %38 = vector.load %arg6[%c0_18, %c0_19] : memref<144x2xf32, #tpu.memory_space<vmem>>, vector<144x1xf32>
    %39 = vector.extract_strided_slice %37 {offsets = [0, 0], sizes = [1, 8], strides = [1, 1]} : vector<2x8xf32> to vector<1x8xf32>
    %40 = vector.broadcast %38 : vector<144x1xf32> to vector<144x8xf32>
    %41 = vector.broadcast %39 : vector<1x8xf32> to vector<144x8xf32>
    %42 = arith.mulf %40, %41 : vector<144x8xf32>
    %c0_20 = arith.constant 0 : index
    %c1_21 = arith.constant 1 : index
    %43 = vector.load %arg6[%c0_20, %c1_21] : memref<144x2xf32, #tpu.memory_space<vmem>>, vector<144x1xf32>
    %44 = vector.extract_strided_slice %37 {offsets = [1, 0], sizes = [1, 8], strides = [1, 1]} : vector<2x8xf32> to vector<1x8xf32>
    %45 = vector.broadcast %43 : vector<144x1xf32> to vector<144x8xf32>
    %46 = vector.broadcast %44 : vector<1x8xf32> to vector<144x8xf32>
    %47 = arith.mulf %45, %46 : vector<144x8xf32>
    %48 = arith.addf %42, %47 : vector<144x8xf32>
    %c0_22 = arith.constant 0 : index
    %c0_23 = arith.constant 0 : index
    %49 = vector.load %arg7[%c0_22, %c0_23] : memref<144x1xf32, #tpu.memory_space<vmem>>, vector<144x1xf32>
    %50 = vector.broadcast %49 : vector<144x1xf32> to vector<144x8xf32>
    %51 = arith.addf %48, %50 : vector<144x8xf32>
    %cst_24 = arith.constant 0.000000e+00 : f32
    %52 = vector.broadcast %cst_24 : f32 to vector<144x8xf32>
    %53 = arith.maximumf %51, %52 : vector<144x8xf32>
    %c0_25 = arith.constant 0 : index
    %c0_26 = arith.constant 0 : index
    %54 = vector.load %arg8[%c0_25, %c0_26] : memref<144x2xf32, #tpu.memory_space<vmem>>, vector<144x1xf32>
    %c0_27 = arith.constant 0 : index
    %c1_28 = arith.constant 1 : index
    %55 = vector.load %arg8[%c0_27, %c1_28] : memref<144x2xf32, #tpu.memory_space<vmem>>, vector<144x1xf32>
    %56 = arith.subf %54, %55 : vector<144x1xf32>
    %c0_29 = arith.constant 0 : index
    %c0_30 = arith.constant 0 : index
    %57 = vector.load %arg9[%c0_29, %c0_30] : memref<2x1xf32, #tpu.memory_space<vmem>>, vector<1x1xf32>
    %c1_31 = arith.constant 1 : index
    %c0_32 = arith.constant 0 : index
    %58 = vector.load %arg9[%c1_31, %c0_32] : memref<2x1xf32, #tpu.memory_space<vmem>>, vector<1x1xf32>
    %59 = arith.subf %57, %58 : vector<1x1xf32>
    %60 = vector.broadcast %56 : vector<144x1xf32> to vector<144x8xf32>
    %61 = arith.mulf %53, %60 : vector<144x8xf32>
    %cst_33 = arith.constant dense<0.000000e+00> : vector<8xf32>
    %62 = vector.multi_reduction <add>, %61, %cst_33 [0] : vector<144x8xf32> to vector<8xf32>
    %63 = vector.shape_cast %62 : vector<8xf32> to vector<1x8xf32>
    %64 = vector.broadcast %59 : vector<1x1xf32> to vector<1x8xf32>
    %65 = arith.addf %63, %64 : vector<1x8xf32>
    %cst_34 = arith.constant 0.000000e+00 : f32
    %66 = vector.broadcast %cst_34 : f32 to vector<1x8xf32>
    %67 = arith.subf %66, %65 : vector<1x8xf32>
    %68 = math.exp %67 : vector<1x8xf32>
    %cst_35 = arith.constant 1.000000e+00 : f32
    %69 = vector.broadcast %cst_35 : f32 to vector<1x8xf32>
    %70 = arith.addf %69, %68 : vector<1x8xf32>
    %71 = tpu.reciprocal %70 : vector<1x8xf32> -> vector<1x8xf32>
    %cst_36 = arith.constant 1.000000e+00 : f32
    %72 = vector.broadcast %cst_36 : f32 to vector<1x8xf32>
    %73 = arith.subf %72, %71 : vector<1x8xf32>
    %74 = tpu.concatenate %71, %73 in 0 : vector<1x8xf32>, vector<1x8xf32> -> vector<2x8xf32>
    %75 = tpu.concatenate %74, %37 in 0 : vector<2x8xf32>, vector<2x8xf32> -> vector<4x8xf32>
    %c0_37 = arith.constant 0 : index
    %c0_38 = arith.constant 0 : index
    %76 = vector.load %arg10[%c0_37, %c0_38] : memref<4x8xf32, #tpu.memory_space<vmem>>, vector<4x8xf32>
    tpu.vector_store %arg10[%c0_37, %c0_38], %75 {strides = array<i32>} : memref<4x8xf32, #tpu.memory_space<vmem>>, vector<4x8xf32>,
    return
  }
  func.func @transform_0(%arg0: i32) -> (i32, i32) {
    %c0_i32 = arith.constant 0 : i32
    %c0_i32_0 = arith.constant 0 : i32
    return %c0_i32, %arg0 : i32, i32
  }
  func.func @transform_1(%arg0: i32) -> (i32, i32) {
    %c0_i32 = arith.constant 0 : i32
    %c0_i32_0 = arith.constant 0 : i32
    %c0_i32_1 = arith.constant 0 : i32
    return %c0_i32, %c0_i32_0 : i32, i32
  }
  func.func @transform_2(%arg0: i32) -> (i32, i32) {
    %c0_i32 = arith.constant 0 : i32
    %c0_i32_0 = arith.constant 0 : i32
    %c0_i32_1 = arith.constant 0 : i32
    return %c0_i32, %c0_i32_0 : i32, i32
  }
  func.func @transform_3(%arg0: i32) -> (i32, i32) {
    %c0_i32 = arith.constant 0 : i32
    %c0_i32_0 = arith.constant 0 : i32
    %c0_i32_1 = arith.constant 0 : i32
    return %c0_i32, %c0_i32_0 : i32, i32
  }
  func.func @transform_4(%arg0: i32) -> (i32, i32) {
    %c0_i32 = arith.constant 0 : i32
    %c0_i32_0 = arith.constant 0 : i32
    %c0_i32_1 = arith.constant 0 : i32
    return %c0_i32, %c0_i32_0 : i32, i32
  }
  func.func @transform_5(%arg0: i32) -> (i32, i32) {
    %c0_i32 = arith.constant 0 : i32
    %c0_i32_0 = arith.constant 0 : i32
    %c0_i32_1 = arith.constant 0 : i32
    return %c0_i32, %c0_i32_0 : i32, i32
  }
  func.func @transform_6(%arg0: i32) -> (i32, i32) {
    %c0_i32 = arith.constant 0 : i32
    %c0_i32_0 = arith.constant 0 : i32
    %c0_i32_1 = arith.constant 0 : i32
    return %c0_i32, %c0_i32_0 : i32, i32
  }
  func.func @transform_7(%arg0: i32) -> (i32, i32) {
    %c0_i32 = arith.constant 0 : i32
    %c0_i32_0 = arith.constant 0 : i32
    %c0_i32_1 = arith.constant 0 : i32
    return %c0_i32, %c0_i32_0 : i32, i32
  }
  func.func @transform_8(%arg0: i32) -> (i32, i32) {
    %c0_i32 = arith.constant 0 : i32
    %c0_i32_0 = arith.constant 0 : i32
    %c0_i32_1 = arith.constant 0 : i32
    return %c0_i32, %c0_i32_0 : i32, i32
  }
  func.func @transform_9(%arg0: i32) -> (i32, i32) {
    %c0_i32 = arith.constant 0 : i32
    %c0_i32_0 = arith.constant 0 : i32
    return %c0_i32, %arg0 : i32, i32
  }
}

</mosaic_0001>

<bundles_post_ra>
// kernel: tpu_custom_call.1
= control target key start
LH: loop header
LB: loop body
LE: loop exit
PB: predicated region body
PF: predicated region fallthrough
CT: control target
= control target key end

     0   :  { %v2512_v2 = vmov 1   ;;  %v2510_v3 = vmov 0   ;;  %s2500_s0 = inlined_call_operand.vmem [shape: f32[2,8], index: 0, kind: input, shape index: {}]   ;;  %s2501_s1 = inlined_call_operand.vmem [shape: f32[144,2], index: 1, kind: input, shape index: {}]   ;;  %s2502_s2 = inlined_call_operand.vmem [shape: f32[144,1], index: 2, kind: input, shape index: {}]   ;;  %s2503_s3 = inlined_call_operand.vmem [shape: f32[144,2], index: 3, kind: input, shape index: {}]   ;;  %s2504_s4 = inlined_call_operand.vmem [shape: f32[2,1], index: 4, kind: input, shape index: {}]   ;;  %s2505_s5 = inlined_call_operand.vmem [shape: f32[144,2], index: 5, kind: input, shape index: {}]   ;;  %s2506_s6 = inlined_call_operand.vmem [shape: f32[144,1], index: 6, kind: input, shape index: {}]   ;;  %s2507_s7 = inlined_call_operand.vmem [shape: f32[144,2], index: 7, kind: input, shape index: {}]   ;;  %s2508_s8 = inlined_call_operand.vmem [shape: f32[2,1], index: 8, kind: input, shape index: {}]   ;;  %s2509_s9 = inlined_call_operand.hbm [shape: f32[4,8], index: 9, kind: output, shape index: {}]  }
   0x1   :  { %v36_v0 = vld [vmem:[%s2501_s1 + $0x10] sm:$0xff]  ;;  %v1492_v1 = vld [vmem:[%s2501_s1] sm:$0xff]  ;;  %1386 = vset.pattern.permute.xlu0 %v2512_v2  ;;  %1385 = vset.pattern.permute.xlu1 %v2510_v3  ;;  %v37_v4 = vld [vmem:[%s2501_s1 + $0x18] sm:$0xff] }
   0x2   :  { %64 = vperm.xlu1 %1385, %v36_v0   ;;  %165 = vperm.xlu0 %1386, %v1492_v1   ;;  %v39_v5 = vld [vmem:[%s2501_s1 + $0x28] sm:$0xff]  ;;  %v41_v6 = vld [vmem:[%s2501_s1 + $0x38] sm:$0xff] }
   0x3   :  { %v43_v7 = vld [vmem:[%s2501_s1 + $0x48] sm:$0xff]  ;;  %v45_v8 = vld [vmem:[%s2501_s1 + $0x58] sm:$0xff] }
   0x6   :  { %69 = vperm.xlu1 %1385, %v37_v4   ;;  %177 = vperm.xlu0 %1386, %v37_v4  }
   0xa   :  { %79 = vperm.xlu1 %1385, %v39_v5   ;;  %185 = vperm.xlu0 %1386, %v39_v5  }
   0xe   :  { %89 = vperm.xlu1 %1385, %v41_v6   ;;  %193 = vperm.xlu0 %1386, %v41_v6  }
  0x12   :  { %99 = vperm.xlu1 %1385, %v43_v7   ;;  %201 = vperm.xlu0 %1386, %v43_v7  }
  0x13   :  { %14 = vsyncpa [#allocation3], 0  ;;  %v47_v9 = vld [vmem:[%s2501_s1 + $0x68] sm:$0xff]  ;;  %v49_v10 = vld [vmem:[%s2501_s1 + $0x78] sm:$0xff]  ;;  %s1434_s12 = smov 127   ;;  %vm639_vm0 = vcmask 64512  }
  0x14   :  { %v51_v11 = vld [vmem:[%s2501_s1 + $0x88] sm:$0xff]  ;;  %v1524_v12 = vld [vmem:[%s2503_s3] sm:$0xff]  ;;  %v1538_v14 = vld [vmem:[%s2503_s3 + $0x10] sm:$0xff]  ;;  %vm696_vm1 = vcmask 1040384   ;;  %vm1363_vm2 = vcmask 1041408   ;;  %vm1365_vm3 = vcmask 60416  }
  0x15   :  { %v1529_v13 = vld [vmem:[%s2501_s1 + $0x8] sm:$0xff]  ;;  %v1545_v15 = vld [vmem:[%s2503_s3 + $0x20] sm:$0xff]  ;;  %v1558_v17 = vld [vmem:[%s2503_s3 + $0x30] sm:$0xff] }
  0x16   :  { %109 = vperm.xlu1 %1385, %v45_v8   ;;  %209 = vperm.xlu0 %1386, %v45_v8   ;;  %v1550_v16 = vld [vmem:[%s2501_s1 + $0x20] sm:$0xff]  ;;  %v1563_v18 = vld [vmem:[%s2501_s1 + $0x30] sm:$0xff]  ;;  %v1636_v29 = vld [vmem:[%s2505_s5 + $0x8] sm:$0xff] }
  0x17   :  { %v1571_v19 = vld [vmem:[%s2503_s3 + $0x40] sm:$0xff]  ;;  %v1584_v21 = vld [vmem:[%s2503_s3 + $0x50] sm:$0xff]  ;;  %v279_v34 = vld [vmem:[%s2502_s2 + $0x18] sm:$0xff] }
  0x18   :  { %v1576_v20 = vld [vmem:[%s2501_s1 + $0x40] sm:$0xff]  ;;  %v1589_v22 = vld [vmem:[%s2501_s1 + $0x50] sm:$0xff]  ;;  %v281_v36 = vld [vmem:[%s2502_s2 + $0x28] sm:$0xff] }
  0x19   :  { %v1597_v23 = vld [vmem:[%s2503_s3 + $0x60] sm:$0xff]  ;;  %v1610_v25 = vld [vmem:[%s2503_s3 + $0x70] sm:$0xff]  ;;  %v283_v38 = vld [vmem:[%s2502_s2 + $0x38] sm:$0xff] }
  0x1a   :  { %119 = vperm.xlu1 %1385, %v47_v9   ;;  %217 = vperm.xlu0 %1386, %v47_v9   ;;  %v1602_v24 = vld [vmem:[%s2501_s1 + $0x60] sm:$0xff]  ;;  %v1615_v26 = vld [vmem:[%s2501_s1 + $0x70] sm:$0xff]  ;;  %v1682_v39 = vld [vmem:[%s2507_s7 + $0x8] sm:$0xff] }
  0x1b   :  { %v1623_v27 = vld [vmem:[%s2503_s3 + $0x80] sm:$0xff]  ;;  %v278_v32 = vld [vmem:[%s2502_s2 + $0x10] sm:$0xff]  ;;  %v285_v40 = vld [vmem:[%s2502_s2 + $0x48] sm:$0xff] }
  0x1c   :  { %v1628_v28 = vld [vmem:[%s2501_s1 + $0x80] sm:$0xff]  ;;  %v1655_v33 = vld [vmem:[%s2505_s5 + $0x30] sm:$0xff]  ;;  %v1087_v41 = vld [vmem:[%s2507_s7 + $0x18] sm:$0xff] }
  0x1d   :  { %v276_v30 = vld [vmem:[%s2502_s2] sm:$0xff]  ;;  %v1673_v37 = vld [vmem:[%s2505_s5 + $0x50] sm:$0xff]  ;;  %v287_v42 = vld [vmem:[%s2502_s2 + $0x58] sm:$0xff] }
  0x1e   :  { %129 = vperm.xlu1 %1385, %v49_v10   ;;  %225 = vperm.xlu0 %1386, %v49_v10   ;;  %v1646_v31 = vld [vmem:[%s2505_s5 + $0x20] sm:$0xff]  ;;  %v1089_v43 = vld [vmem:[%s2507_s7 + $0x28] sm:$0xff]  ;;  %v1091_v45 = vld [vmem:[%s2507_s7 + $0x38] sm:$0xff] }
  0x1f   :  { %v1664_v35 = vld [vmem:[%s2505_s5 + $0x40] sm:$0xff]  ;;  %v289_v44 = vld [vmem:[%s2502_s2 + $0x68] sm:$0xff]  ;;  %v291_v46 = vld [vmem:[%s2502_s2 + $0x78] sm:$0xff] }
  0x20   :  { %v1093_v47 = vld [vmem:[%s2507_s7 + $0x48] sm:$0xff]  ;;  %v1095_v49 = vld [vmem:[%s2507_s7 + $0x58] sm:$0xff]  ;;  %v1766_v59 = vld [vmem:[%s2505_s5 + $0x60] sm:$0xff] }
  0x21   :  { %v293_v48 = vld [vmem:[%s2502_s2 + $0x88] sm:$0xff]  ;;  %v1734_v52 = vld [vmem:[%s2503_s3 + $0x18] sm:$0xff]  ;;  %v1783_v63 = vld [vmem:[%s2505_s5 + $0x70] sm:$0xff] }
  0x22   :  { %139 = vperm.xlu1 %1385, %v51_v11   ;;  %233 = vperm.xlu0 %1386, %v51_v11   ;;  %v1723_v50 = vld [vmem:[%s2503_s3 + $0x8] sm:$0xff]  ;;  %v1099_v53 = vld [vmem:[%s2507_s7 + $0x78] sm:$0xff] }
  0x23   :  { %v1097_v51 = vld [vmem:[%s2507_s7 + $0x68] sm:$0xff]  ;;  %v1760_v58 = vld [vmem:[%s2503_s3 + $0x38] sm:$0xff] }
  0x24   :  { %v1745_v54 = vld [vmem:[%s2503_s3 + $0x28] sm:$0xff]  ;;  %v1794_v5 = vld [vmem:[%s2503_s3 + $0x58] sm:$0xff] }
  0x25   :  { %v1101_v55 = vld [vmem:[%s2507_s7 + $0x88] sm:$0xff] }
  0x26   :  { %1387 = vset.pattern.permute.xlu1 %v2512_v2  ;;  %456 = vrot.lane.b32.xlu0 %v1524_v12, %s1434_s12  ;;  %v1777_v62 = vld [vmem:[%s2503_s3 + $0x48] sm:$0xff] }
  0x27   :  { %169 = vperm.xlu1 %1387, %v1529_v13   ;;  %v1800_v6 = vld [vmem:[%s2505_s5 + $0x88] sm:$0xff] }
  0x28   :  { %v1811_v9 = vld [vmem:[%s2503_s3 + $0x68] sm:$0xff] }
  0x2a   :  { %460 = vrot.lane.b32.xlu0 %v1538_v14, %s1434_s12 }
  0x2b   :  { %173 = vperm.xlu1 %1387, %v36_v0  }
  0x2e   :  { %464 = vrot.lane.b32.xlu0 %v1545_v15, %s1434_s12 }
  0x2f   :  { %181 = vperm.xlu1 %1387, %v1550_v16  }
  0x32   :  { %468 = vrot.lane.b32.xlu0 %v1558_v17, %s1434_s12 }
  0x33   :  { %189 = vperm.xlu1 %1387, %v1563_v18  }
  0x36   :  { %472 = vrot.lane.b32.xlu0 %v1571_v19, %s1434_s12 }
  0x37   :  { %197 = vperm.xlu1 %1387, %v1576_v20  }
  0x3a   :  { %476 = vrot.lane.b32.xlu0 %v1584_v21, %s1434_s12 }
  0x3b   :  { %205 = vperm.xlu1 %1387, %v1589_v22  }
  0x3e   :  { %480 = vrot.lane.b32.xlu0 %v1597_v23, %s1434_s12 }
  0x3f   :  { %213 = vperm.xlu1 %1387, %v1602_v24  }
  0x42   :  { %484 = vrot.lane.b32.xlu0 %v1610_v25, %s1434_s12 }
  0x43   :  { %221 = vperm.xlu1 %1387, %v1615_v26  }
  0x46   :  { %488 = vrot.lane.b32.xlu0 %v1623_v27, %s1434_s12 }
  0x47   :  { %229 = vperm.xlu1 %1387, %v1628_v28  }
  0x4a   :  { %833 = vperm.xlu0 %1386, %v1636_v29  }
  0x4b   :  { %1388 = vset.pattern.permute.xlu1 %v2510_v3 }
  0x4c   :  { %296 = vperm.xlu1 %1388, %v276_v30   ;;  %v1823_v30 = vld [vmem:[%s2503_s3 + $0x78] sm:$0xff] }
  0x4e   :  { %845 = vperm.xlu0 %1386, %v1646_v31  }
  0x50   :  { %306 = vperm.xlu1 %1388, %v278_v32  }
  0x52   :  { %853 = vperm.xlu0 %1386, %v1655_v33  }
  0x54   :  { %311 = vperm.xlu1 %1388, %v279_v34  }
  0x56   :  { %861 = vperm.xlu0 %1386, %v1664_v35  }
  0x58   :  { %321 = vperm.xlu1 %1388, %v281_v36   ;;  %v1836_v36 = vld [vmem:[%s2503_s3 + $0x88] sm:$0xff] }
  0x5a   :  { %869 = vperm.xlu0 %1386, %v1673_v37  }
  0x5c   :  { %331 = vperm.xlu1 %1388, %v283_v38  }
  0x5e   :  { %1122 = vrot.lane.b32.xlu0 %v1682_v39, %s1434_s12 }
  0x60   :  { %341 = vperm.xlu1 %1388, %v285_v40  }
  0x62   :  { %1126 = vrot.lane.b32.xlu0 %v1087_v41, %s1434_s12 }
  0x64   :  { %351 = vperm.xlu1 %1388, %v287_v42  }
  0x66   :  { %1130 = vrot.lane.b32.xlu0 %v1089_v43, %s1434_s12 }
  0x68   :  { %361 = vperm.xlu1 %1388, %v289_v44  }
  0x6a   :  { %1134 = vrot.lane.b32.xlu0 %v1091_v45, %s1434_s12 }
  0x6c   :  { %371 = vperm.xlu1 %1388, %v291_v46  }
  0x6e   :  { %1138 = vrot.lane.b32.xlu0 %v1093_v47, %s1434_s12 }
  0x70   :  { %381 = vperm.xlu1 %1388, %v293_v48  }
  0x72   :  { %1142 = vrot.lane.b32.xlu0 %v1095_v49, %s1434_s12 }
  0x74   :  { %458 = vrot.lane.b32.xlu1 %v1723_v50, %s1434_s12 }
  0x76   :  { %1146 = vrot.lane.b32.xlu0 %v1097_v51, %s1434_s12 }
  0x78   :  { %462 = vrot.lane.b32.xlu1 %v1734_v52, %s1434_s12 }
  0x7a   :  { %1150 = vrot.lane.b32.xlu0 %v1099_v53, %s1434_s12 }
  0x7c   :  { %466 = vrot.lane.b32.xlu1 %v1745_v54, %s1434_s12 }
  0x7d   :  { %v1753_v56 = vpop.permute.xlu1 %64  ;;  %v1755_v57 = vpop.permute.xlu0 %165 }
  0x7e   :  { %1154 = vrot.lane.b32.xlu0 %v1101_v55, %s1434_s12 }
  0x80   :  { %470 = vrot.lane.b32.xlu1 %v1760_v58, %s1434_s12 }
  0x81   :  { %v1770_v60 = vpop.permute.xlu1 %69  ;;  %v1772_v61 = vpop.permute.xlu0 %177 }
  0x82   :  { %877 = vperm.xlu0 %1386, %v1766_v59  }
  0x84   :  { %474 = vrot.lane.b32.xlu1 %v1777_v62, %s1434_s12 }
  0x85   :  { %v1787_v0 = vpop.permute.xlu1 %79  ;;  %v1789_v4 = vpop.permute.xlu0 %185 }
  0x86   :  { %885 = vperm.xlu0 %1386, %v1783_v63  }
  0x88   :  { %478 = vrot.lane.b32.xlu1 %v1794_v5, %s1434_s12 }
  0x89   :  { %v1804_v7 = vpop.permute.xlu1 %89  ;;  %v1806_v8 = vpop.permute.xlu0 %193 }
  0x8a   :  { %897 = vperm.xlu0 %1386, %v1800_v6  }
  0x8c   :  { %482 = vrot.lane.b32.xlu1 %v1811_v9, %s1434_s12 }
  0x8d   :  { %v1816_v10 = vpop.permute.xlu1 %99  ;;  %v1818_v11 = vpop.permute.xlu0 %201 }
  0x8e   :  { %1393 = vset.pattern.permute.xlu0 %v2510_v3 }
  0x8f   :  { %54 = vperm.xlu0 %1393, %v1492_v1  }
  0x90   :  { %486 = vrot.lane.b32.xlu1 %v1823_v30, %s1434_s12 }
  0x91   :  { %v1829_v32 = vpop.permute.xlu1 %109  ;;  %v1831_v34 = vpop.permute.xlu0 %209 }
  0x92   :  { %2520 = vst [vmem:[#allocation5_spill] sm:$0xff] %v1831_v34 }
  0x93   :  { %59 = vperm.xlu0 %1393, %v1529_v13  }
  0x94   :  { %490 = vrot.lane.b32.xlu1 %v1836_v36, %s1434_s12 }
  0x95   :  { %v1841_v38 = vpop.permute.xlu1 %119  ;;  %v1843_v1 = vpop.permute.xlu0 %217 }
  0x96   :  { %2521 = vst [vmem:[#allocation6_spill] sm:$0xff] %v1841_v38  ;;  %2522 = vst [vmem:[#allocation7_spill] sm:$0xff] %v1843_v1 }
  0x97   :  { %74 = vperm.xlu0 %1393, %v1550_v16  }
  0x99   :  { %v1846_v40 = vpop.permute.xlu1 %129  ;;  %v1848_v41 = vpop.permute.xlu0 %225 }
  0x9a   :  { %2523 = vst [vmem:[#allocation8_spill] sm:$0xff] %v1846_v40  ;;  %2524 = vst [vmem:[#allocation9_spill] sm:$0xff] %v1848_v41 }
  0x9b   :  { %84 = vperm.xlu0 %1393, %v1563_v18  }
  0x9d   :  { %v1851_v42 = vpop.permute.xlu1 %139  ;;  %v1853_v43 = vpop.permute.xlu0 %233 }
  0x9e   :  { %2525 = vst [vmem:[#allocation10_spill] sm:$0xff] %v1851_v42  ;;  %2526 = vst [vmem:[#allocation11_spill] sm:$0xff] %v1853_v43 }
  0x9f   :  { %94 = vperm.xlu0 %1393, %v1576_v20   ;;  %v277_v20 = vld [vmem:[%s2502_s2 + $0x8] sm:$0xff] }
  0xa1   :  { %v457_v13 = vpop.permute.xlu0 %456 }
  0xa2   :  { %v1856_v44 = vpop.permute.xlu1 %169 }
  0xa3   :  { %104 = vperm.xlu0 %1393, %v1589_v22  }
  0xa5   :  { %v461_v45 = vpop.permute.xlu0 %460 }
  0xa6   :  { %v1859_v46 = vpop.permute.xlu1 %173  ;;  %v512_v38 = vsub.f32 %v1538_v14, %v461_v45 }
  0xa7   :  { %114 = vperm.xlu0 %1393, %v1602_v24   ;;  %v280_v24 = vld [vmem:[%s2502_s2 + $0x20] sm:$0xff] }
  0xa9   :  { %v465_v16 = vpop.permute.xlu0 %464 }
  0xaa   :  { %v1862_v47 = vpop.permute.xlu1 %181 }
  0xab   :  { %124 = vperm.xlu0 %1393, %v1615_v26   ;;  %v282_v26 = vld [vmem:[%s2502_s2 + $0x30] sm:$0xff] }
  0xad   :  { %v469_v18 = vpop.permute.xlu0 %468 }
  0xae   :  { %v1865_v48 = vpop.permute.xlu1 %189 }
  0xaf   :  { %134 = vperm.xlu0 %1393, %v1628_v28  }
  0xb1   :  { %v473_v22 = vpop.permute.xlu0 %472 }
  0xb2   :  { %v1871_v49 = vpop.permute.xlu1 %197  ;;  %v518_v14 = vsub.f32 %v1571_v19, %v473_v22 }
  0xb3   :  { %301 = vperm.xlu0 %1393, %v277_v20   ;;  %v284_v20 = vld [vmem:[%s2502_s2 + $0x40] sm:$0xff] }
  0xb5   :  { %v477_v51 = vpop.permute.xlu0 %476 }
  0xb6   :  { %v1876_v53 = vpop.permute.xlu1 %205 }
  0xb7   :  { %2527 = vst [vmem:[#allocation12_spill] sm:$0xff] %v1876_v53  ;;  %316 = vperm.xlu0 %1393, %v280_v24   ;;  %v286_v24 = vld [vmem:[%s2502_s2 + $0x50] sm:$0xff] }
  0xb9   :  { %v481_v28 = vpop.permute.xlu0 %480 }
  0xba   :  { %v1881_v55 = vpop.permute.xlu1 %213 }
  0xbb   :  { %2528 = vst [vmem:[#allocation13_spill] sm:$0xff] %v1881_v55  ;;  %326 = vperm.xlu0 %1393, %v282_v26   ;;  %v288_v26 = vld [vmem:[%s2502_s2 + $0x60] sm:$0xff] }
  0xbd   :  { %v485_v3 = vpop.permute.xlu0 %484 }
  0xbe   :  { %v1886_v2 = vpop.permute.xlu1 %221  ;;  %v524_v19 = vsub.f32 %v1610_v25, %v485_v3 }
  0xbf   :  { %2529 = vst [vmem:[#allocation14_spill] sm:$0xff] %v1886_v2  ;;  %336 = vperm.xlu0 %1393, %v284_v20   ;;  %v290_v20 = vld [vmem:[%s2502_s2 + $0x70] sm:$0xff] }
  0xc1   :  { %v489_v43 = vpop.permute.xlu0 %488 }
  0xc2   :  { %v1891_v42 = vpop.permute.xlu1 %229 }
  0xc3   :  { %2530 = vst [vmem:[#allocation15_spill] sm:$0xff] %v1891_v42  ;;  %346 = vperm.xlu0 %1393, %v286_v24   ;;  %v292_v24 = vld [vmem:[%s2502_s2 + $0x80] sm:$0xff] }
  0xc5   :  { %v1896_v41 = vpop.permute.xlu0 %833 }
  0xc6   :  { %2531 = vst [vmem:[#allocation16_spill] sm:$0xff] %v1896_v41  ;;  %v510_v41 = vsub.f32 %v1524_v12, %v457_v13  ;;  %v516_v12 = vsub.f32 %v1558_v17, %v469_v18  ;;  %v522_v17 = vsub.f32 %v1597_v23, %v481_v28  ;;  %v528_v23 = vld [vmem:[%s2504_s4] sm:$0x1]  ;;  %v529_v28 = vld [vmem:[%s2504_s4 + $0x1] sm:$0x1] }
  0xc7   :  { %v1898_v40 = vpop.permute.xlu1 %296  ;;  %356 = vperm.xlu0 %1393, %v288_v26  }
  0xc9   :  { %v1903_v2 = vpop.permute.xlu0 %845 }
  0xca   :  { %2532 = vst [vmem:[#allocation17_spill] sm:$0xff] %v1903_v2 }
  0xcb   :  { %v1905_v55 = vpop.permute.xlu1 %306  ;;  %366 = vperm.xlu0 %1393, %v290_v20   ;;  %v514_v20 = vsub.f32 %v1545_v15, %v465_v16  ;;  %v520_v15 = vsub.f32 %v1584_v21, %v477_v51  ;;  %v526_v21 = vsub.f32 %v1623_v27, %v489_v43 }
  0xcd   :  { %v1910_v42 = vpop.permute.xlu0 %853 }
  0xce   :  { %2533 = vst [vmem:[#allocation18_spill] sm:$0xff] %v1910_v42 }
  0xcf   :  { %v1913_v1 = vpop.permute.xlu1 %311  ;;  %376 = vperm.xlu0 %1393, %v292_v24  }
  0xd1   :  { %v1915_v26 = vpop.permute.xlu0 %861 }
  0xd3   :  { %v1918_v34 = vpop.permute.xlu1 %321  ;;  %533 = vperm.xlu0 %1393, %v510_v41  }
  0xd5   :  { %v1920_v2 = vpop.permute.xlu0 %869 }
  0xd7   :  { %v1923_v53 = vpop.permute.xlu1 %331  ;;  %543 = vperm.xlu0 %1393, %v512_v38  }
  0xd9   :  { %v1925_v42 = vpop.permute.xlu0 %1122 }
  0xdb   :  { %v1928_v13 = vpop.permute.xlu1 %341  ;;  %553 = vperm.xlu0 %1393, %v514_v20  }
  0xdd   :  { %v1930_v24 = vpop.permute.xlu0 %1126 }
  0xde   :  { %2534 = vst [vmem:[#allocation19_spill] sm:$0xff] %v1930_v24 }
  0xdf   :  { %v1933_v45 = vpop.permute.xlu1 %351  ;;  %563 = vperm.xlu0 %1393, %v516_v12  }
  0xe1   :  { %v1935_v41 = vpop.permute.xlu0 %1130 }
  0xe2   :  { %2535 = vst [vmem:[#allocation20_spill] sm:$0xff] %v1935_v41 }
  0xe3   :  { %v1938_v16 = vpop.permute.xlu1 %361  ;;  %573 = vperm.xlu0 %1393, %v518_v14  }
  0xe5   :  { %v1940_v38 = vpop.permute.xlu0 %1134 }
  0xe6   :  { %2536 = vst [vmem:[#allocation21_spill] sm:$0xff] %v1940_v38 }
  0xe7   :  { %v1943_v18 = vpop.permute.xlu1 %371  ;;  %583 = vperm.xlu0 %1393, %v520_v15   ;;  %v530_v15 = vsub.f32 %v528_v23, %v529_v28  ;;  %v1982_v28 = vld [vmem:[%s2505_s5 + $0x28] sm:$0xff] }
  0xe9   :  { %v1945_v20 = vpop.permute.xlu0 %1138 }
  0xea   :  { %2537 = vst [vmem:[#allocation22_spill] sm:$0xff] %v1945_v20  ;;  %v2118_v20 = vld [vmem:[%s2507_s7 + $0x30] sm:$0xff] }
  0xeb   :  { %v1948_v22 = vpop.permute.xlu1 %381  ;;  %593 = vperm.xlu0 %1393, %v522_v17   ;;  %2548 = vst [vmem:[#allocation32_spill] sm:$0xff] %v2118_v20 }
  0xed   :  { %v1950_v12 = vpop.permute.xlu0 %1142 }
  0xee   :  { %2538 = vst [vmem:[#allocation23_spill] sm:$0xff] %v1950_v12 }
  0xef   :  { %v459_v51 = vpop.permute.xlu1 %458  ;;  %603 = vperm.xlu0 %1393, %v524_v19  }
  0xf0   :  { %v511_v14 = vsub.f32 %v1723_v50, %v459_v51 }
  0xf1   :  { %v1960_v3 = vpop.permute.xlu0 %1146 }
  0xf2   :  { %2539 = vst [vmem:[#allocation24_spill] sm:$0xff] %v1960_v3  ;;  %538 = vperm.xlu1 %1388, %v511_v14  }
  0xf3   :  { %v463_v25 = vpop.permute.xlu1 %462  ;;  %613 = vperm.xlu0 %1393, %v526_v21   ;;  %v1973_v21 = vld [vmem:[%s2505_s5 + $0x18] sm:$0xff] }
  0xf4   :  { %v513_v27 = vsub.f32 %v1734_v52, %v463_v25 }
  0xf5   :  { %v1963_v43 = vpop.permute.xlu0 %1150 }
  0xf6   :  { %2540 = vst [vmem:[#allocation25_spill] sm:$0xff] %v1963_v43  ;;  %548 = vperm.xlu1 %1388, %v513_v27   ;;  %v2080_v43 = vld [vmem:[%s2507_s7] sm:$0xff] }
  0xf7   :  { %v467_v50 = vpop.permute.xlu1 %466  ;;  %683 = vperm.xlu0 %1393, %v530_v15   ;;  %v705_v15 = vld [vmem:[%s2505_s5 + $0x38] sm:$0xff] }
  0xf8   :  { %v515_v17 = vsub.f32 %v1745_v54, %v467_v50 }
  0xf9   :  { %v1966_v19 = vpop.permute.xlu0 %1154 }
  0xfa   :  { %2541 = vst [vmem:[#allocation26_spill] sm:$0xff] %v1966_v19  ;;  %558 = vperm.xlu1 %1388, %v515_v17   ;;  %v707_v17 = vld [vmem:[%s2505_s5 + $0x48] sm:$0xff] }
  0xfb   :  { %v471_v51 = vpop.permute.xlu1 %470  ;;  %723 = vperm.xlu0 %1393, %v1636_v29  }
  0xfc   :  { %v517_v14 = vsub.f32 %v1760_v58, %v471_v51 }
  0xfd   :  { %v1975_v52 = vpop.permute.xlu0 %877 }
  0xfe   :  { %2542 = vst [vmem:[#allocation27_spill] sm:$0xff] %v1975_v52  ;;  %568 = vperm.xlu1 %1388, %v517_v14  }
  0xff   :  { %v475_v23 = vpop.permute.xlu1 %474  ;;  %733 = vperm.xlu0 %1393, %v1973_v21  }
 0x100   :  { %v519_v54 = vsub.f32 %v1777_v62, %v475_v23  ;;  %v2003_v23 = vld [vmem:[%s2505_s5 + $0x58] sm:$0xff] }
 0x101   :  { %v1984_v29 = vpop.permute.xlu0 %885 }
 0x102   :  { %2543 = vst [vmem:[#allocation28_spill] sm:$0xff] %v1984_v29  ;;  %578 = vperm.xlu1 %1388, %v519_v54  }
 0x103   :  { %v479_v58 = vpop.permute.xlu1 %478  ;;  %743 = vperm.xlu0 %1393, %v1982_v28  }
 0x104   :  { %v521_v25 = vsub.f32 %v1794_v5, %v479_v58 }
 0x105   :  { %v1991_v27 = vpop.permute.xlu0 %897 }
 0x106   :  { %2544 = vst [vmem:[#allocation29_spill] sm:$0xff] %v1991_v27  ;;  %588 = vperm.xlu1 %1388, %v521_v25   ;;  %v2012_v25 = vld [vmem:[%s2505_s5 + $0x68] sm:$0xff]  ;;  %v943_v27 = vld [vmem:[%s2506_s6 + $0x18] sm:$0xff] }
 0x107   :  { %v483_v62 = vpop.permute.xlu1 %482  ;;  %753 = vperm.xlu0 %1393, %v705_v15  }
 0x108   :  { %v523_v50 = vsub.f32 %v1811_v9, %v483_v62  ;;  %v698_v62 = vld [vmem:[%s2505_s5] sm:$0xff] }
 0x10a   :  { %598 = vperm.xlu1 %1388, %v523_v50   ;;  %v1997_v51 = vpop.permute.xlu0 %54  ;;  %v2023_v50 = vld [vmem:[%s2505_s5 + $0x78] sm:$0xff] }
 0x10b   :  { %v487_v14 = vpop.permute.xlu1 %486  ;;  %763 = vperm.xlu0 %1393, %v707_v17  }
 0x10c   :  { %v525_v5 = vsub.f32 %v1823_v30, %v487_v14  ;;  %v700_v14 = vld [vmem:[%s2505_s5 + $0x10] sm:$0xff] }
 0x10e   :  { %608 = vperm.xlu1 %1388, %v525_v5   ;;  %v2005_v54 = vpop.permute.xlu0 %59 }
 0x10f   :  { %v491_v9 = vpop.permute.xlu1 %490  ;;  %773 = vperm.xlu0 %1393, %v2003_v23  }
 0x110   :  { %v527_v58 = vsub.f32 %v1836_v36, %v491_v9  ;;  %v940_v9 = vld [vmem:[%s2506_s6] sm:$0xff] }
 0x112   :  { %618 = vperm.xlu1 %1388, %v527_v58   ;;  %v2014_v30 = vpop.permute.xlu0 %74 }
 0x113   :  { %783 = vperm.xlu0 %1393, %v2012_v25  }
 0x116   :  { %718 = vperm.xlu1 %1388, %v698_v62   ;;  %v2025_v36 = vpop.permute.xlu0 %84 }
 0x117   :  { %793 = vperm.xlu0 %1393, %v2023_v50  }
 0x11a   :  { %728 = vperm.xlu1 %1388, %v700_v14   ;;  %v2031_v5 = vpop.permute.xlu0 %94 }
 0x11b   :  { %803 = vperm.xlu0 %1393, %v1800_v6   ;;  %v1175_v6 = vsub.f32 %v1682_v39, %v1925_v42  ;;  %v2061_v39 = vld [vmem:[%s2505_s5 + $0x80] sm:$0xff]  ;;  %v2546_v42 = vmov 1  }
 0x11c   :  { %2545 = vst [vmem:[#allocation30_spill] sm:$0xff] %v2061_v39 }
 0x11e   :  { %738 = vperm.xlu1 %1388, %v1646_v31   ;;  %v2038_v58 = vpop.permute.xlu0 %104 }
 0x11f   :  { %960 = vperm.xlu0 %1393, %v940_v9  }
 0x122   :  { %748 = vperm.xlu1 %1388, %v1655_v33   ;;  %v2044_v3 = vpop.permute.xlu0 %114 }
 0x123   :  { %975 = vperm.xlu0 %1393, %v943_v27  }
 0x126   :  { %758 = vperm.xlu1 %1388, %v1664_v35   ;;  %v2049_v19 = vpop.permute.xlu0 %124 }
 0x127   :  { %1202 = vperm.xlu0 %1393, %v1175_v6   ;;  %v142_v6 = vlaneseq }
 0x12a   :  { %768 = vperm.xlu1 %1388, %v1673_v37   ;;  %v2052_v31 = vpop.permute.xlu0 %134 }
 0x12e   :  { %778 = vperm.xlu1 %1388, %v1766_v59   ;;  %v302_v9 = vpop.permute.xlu0 %301 }
 0x132   :  { %788 = vperm.xlu1 %1388, %v1783_v63   ;;  %v2056_v33 = vpop.permute.xlu0 %316 }
 0x136   :  { %798 = vperm.xlu1 %1388, %v2061_v39   ;;  %v2064_v35 = vpop.permute.xlu0 %326  ;;  %v2100_v39 = vld [vmem:[%s2507_s7 + $0x20] sm:$0xff] }
 0x137   :  { %2547 = vst [vmem:[#allocation31_spill] sm:$0xff] %v2100_v39 }
 0x13a   :  { %1389 = vset.pattern.permute.xlu1 %v2546_v42  ;;  %v2067_v37 = vpop.permute.xlu0 %336 }
 0x13b   :  { %829 = vperm.xlu1 %1389, %v698_v62  }
 0x13e   :  { %v2069_v59 = vpop.permute.xlu0 %346 }
 0x13f   :  { %837 = vperm.xlu1 %1389, %v700_v14  }
 0x142   :  { %v2072_v63 = vpop.permute.xlu0 %356 }
 0x143   :  { %841 = vperm.xlu1 %1389, %v1973_v21   ;;  %v2086_v21 = vshrl.u32 %v142_v6, 7  ;;  %v33_v6 = vld [vmem:[%s2500_s0] sm:$0x3] }
 0x145   :  { %v2516_v14 = vsub.s32 1, %v2086_v21 }
 0x146   :  { %v2075_v27 = vpop.permute.xlu0 %366 }
 0x147   :  { %849 = vperm.xlu1 %1389, %v1982_v28   ;;  %v2091_v28 = vld [vmem:[%s2507_s7 + $0x10] sm:$0xff]  ;;  %v2113_v12 = vrot.slane %v33_v6, %v2516_v14 }
 0x149   :  { %v240_v41 = vmul.f32 %v2113_v12, %v1755_v57  ;;  %v242_v14 = vmul.f32 %v2113_v12, %v1859_v46  ;;  %v245_v52 = vmul.f32 %v2113_v12, %v1789_v4 }
 0x14a   :  { %v2082_v62 = vpop.permute.xlu0 %376 }
 0x14b   :  { %857 = vperm.xlu1 %1389, %v705_v15  }
 0x14e   :  { %v534_v15 = vpop.permute.xlu0 %533 }
 0x14f   :  { %865 = vperm.xlu1 %1389, %v707_v17   ;;  %v2517_v17 = vsub.s32 0, %v2086_v21 }
 0x151   :  { %v2109_v42 = vrot.slane %v33_v6, %v2517_v17  ;;  %v2129_v6 = vld [vmem:[%s2507_s7 + $0x40] sm:$0xff] }
 0x152   :  { %v544_v38 = vpop.permute.xlu0 %543  ;;  %2549 = vst [vmem:[#allocation33_spill] sm:$0xff] %v2129_v6 }
 0x153   :  { %1120 = vrot.lane.b32.xlu1 %v2080_v43, %s1434_s12  ;;  %v147_v24 = vmul.f32 %v2109_v42, %v2005_v54  ;;  %v148_v57 = vmul.f32 %v2109_v42, %v1753_v56  ;;  %v149_v46 = vmul.f32 %v2109_v42, %v1770_v60  ;;  %v244_v60 = vmul.f32 %v2113_v12, %v1862_v47 }
 0x154   :  { %v246_v47 = vmul.f32 %v2113_v12, %v1865_v48  ;;  %v249_v48 = vmul.f32 %v2113_v12, %v1818_v11 }
 0x155   :  { %v260_v54 = vadd.f32 %v242_v14, %v148_v57  ;;  %v153_v57 = vmul.f32 %v2109_v42, %v1804_v7  ;;  %v247_v7 = vmul.f32 %v2113_v12, %v1806_v8 }
 0x156   :  { %v554_v29 = vpop.permute.xlu0 %553 }
 0x157   :  { %1124 = vrot.lane.b32.xlu1 %v2091_v28, %s1434_s12 }
 0x15b   :  { %1128 = vrot.lane.b32.xlu1 %v2100_v39, %s1434_s12  ;;  %v146_v39 = vmul.f32 %v2109_v42, %v1997_v51  ;;  %v241_v51 = vmul.f32 %v2113_v12, %v1856_v44  ;;  %v151_v44 = vmul.f32 %v2109_v42, %v1787_v0  ;;  %v152_v0 = vmul.f32 %v2109_v42, %v2025_v36  ;;  %v2180_v36 = vld [vmem:[%s2507_s7 + $0x70] sm:$0xff] }
 0x15d   :  { %v258_v17 = vadd.f32 %v240_v41, %v146_v39  ;;  %v243_v41 = vmul.f32 %v2113_v12, %v1772_v61  ;;  %v150_v39 = vmul.f32 %v2109_v42, %v2014_v30  ;;  %v386_v61 = vadd.f32 %v1905_v55, %v260_v54  ;;  %v564_v30 = vpop.permute.xlu0 %563 }
 0x15f   :  { %1132 = vrot.lane.b32.xlu1 %v2118_v20, %s1434_s12  ;;  %v2144_v20 = vld [vmem:[%s2507_s7 + $0x50] sm:$0xff]  ;;  %v384_v56 = vadd.f32 %v1898_v40, %v258_v17  ;;  %v261_v40 = vadd.f32 %v243_v41, %v149_v46  ;;  %v262_v4 = vadd.f32 %v244_v60, %v150_v39 }
 0x161   :  { %v402_v17 = vmax.f32 %v384_v56, 0.0  ;;  %v387_v55 = vadd.f32 %v1913_v1, %v261_v40  ;;  %v388_v46 = vadd.f32 %v2056_v33, %v262_v4  ;;  %v155_v1 = vmul.f32 %v2109_v42, %v1816_v10  ;;  %v574_v60 = vpop.permute.xlu0 %573 }
 0x162   :  { %v154_v33 = vmul.f32 %v2109_v42, %v2031_v5  ;;  %v248_v56 = vmul.f32 %v2113_v12, %v1871_v49  ;;  %v265_v49 = vadd.f32 %v247_v7, %v153_v57 }
 0x163   :  { %1136 = vrot.lane.b32.xlu1 %v2129_v6, %s1434_s12  ;;  %v259_v6 = vadd.f32 %v241_v51, %v147_v24  ;;  %v2165_v24 = vld [vmem:[%s2507_s7 + $0x60] sm:$0xff]  ;;  %v621_v41 = vmul.f32 %v534_v15, %v402_v17  ;;  %v264_v15 = vadd.f32 %v246_v47, %v152_v0  ;;  %v406_v10 = vmax.f32 %v388_v46, 0.0 }
 0x164   :  { %v266_v4 = vadd.f32 %v248_v56, %v154_v33 }
 0x165   :  { %v385_v14 = vadd.f32 %v302_v9, %v259_v6  ;;  %v263_v9 = vadd.f32 %v245_v52, %v151_v44  ;;  %v404_v6 = vmax.f32 %v386_v61, 0.0  ;;  %v405_v44 = vmax.f32 %v387_v55, 0.0  ;;  %v584_v33 = vpop.permute.xlu0 %583 }
 0x166   :  { %v390_v11 = vadd.f32 %v2064_v35, %v264_v15  ;;  %v640_v61 = vsel %vm639_vm0, %v621_v41, 0.0  ;;  %v625_v35 = vmul.f32 %v554_v29, %v406_v10  ;;  %v157_v55 = vmul.f32 %v2109_v42, %v1829_v32  ;;  %v2551_v29 = vld [vmem:[#allocation5_spill] sm:$0xff] }
 0x167   :  { %1140 = vrot.lane.b32.xlu1 %v2144_v20, %s1434_s12  ;;  %v403_v51 = vmax.f32 %v385_v14, 0.0  ;;  %v623_v54 = vmul.f32 %v544_v38, %v404_v6  ;;  %v389_v8 = vadd.f32 %v1918_v34, %v263_v9  ;;  %v2201_v38 = vld [vmem:[%s2507_s7 + $0x80] sm:$0xff]  ;;  %v267_v14 = vadd.f32 %v249_v48, %v155_v1  ;;  %v2552_v48 = vld [vmem:[#allocation6_spill] sm:$0xff] }
 0x168   :  { %v156_v34 = vmul.f32 %v2109_v42, %v2038_v58  ;;  %v2550_v9 = vld [vmem:[#allocation12_spill] sm:$0xff]  ;;  %v391_v58 = vadd.f32 %v1923_v53, %v265_v49  ;;  %v408_v57 = vmax.f32 %v390_v11, 0.0  ;;  %v392_v41 = vadd.f32 %v2067_v37, %v266_v4  ;;  %v2553_v37 = vld [vmem:[#allocation7_spill] sm:$0xff]  ;;  %v2554_v10 = vld [vmem:[#allocation13_spill] sm:$0xff] }
 0x169   :  { %v643_v17 = vsel %vm639_vm0, %v623_v54, 0.0  ;;  %v250_v6 = vmul.f32 %v2113_v12, %v2550_v9  ;;  %v251_v1 = vmul.f32 %v2113_v12, %v2551_v29  ;;  %v159_v32 = vmul.f32 %v2109_v42, %v2552_v48 }
 0x16a   :  { %v647_v53 = vsel %vm639_vm0, %v625_v35, 0.0  ;;  %v627_v56 = vmul.f32 %v564_v30, %v408_v57  ;;  %v252_v11 = vmul.f32 %v2113_v12, %v2554_v10  ;;  %v409_v49 = vmax.f32 %v391_v58, 0.0  ;;  %v2559_v10 = vld [vmem:[#allocation10_spill] sm:$0xff] }
 0x16b   :  { %1144 = vrot.lane.b32.xlu1 %v2165_v24, %s1434_s12  ;;  %v160_v30 = vmul.f32 %v2109_v42, %v2049_v19 }
 0x16d   :  { %v539_v52 = vpop.permute.xlu1 %538 }
 0x16e   :  { %v622_v39 = vmul.f32 %v539_v52, %v403_v51  ;;  %v407_v51 = vmax.f32 %v389_v8, 0.0  ;;  %v268_v52 = vadd.f32 %v250_v6, %v156_v34  ;;  %v253_v8 = vmul.f32 %v2113_v12, %v2553_v37 }
 0x16f   :  { %1148 = vrot.lane.b32.xlu1 %v2180_v36, %s1434_s12  ;;  %v410_v34 = vmax.f32 %v392_v41, 0.0  ;;  %v2556_v41 = vld [vmem:[#allocation8_spill] sm:$0xff] }
 0x170   :  { %v641_v5 = vsel %vm639_vm0, %v622_v39, 0.0  ;;  %v158_v39 = vmul.f32 %v2109_v42, %v2044_v3 }
 0x171   :  { %v642_v40 = vadd.f32 %v641_v5, %v640_v61  ;;  %v549_v0 = vpop.permute.xlu1 %548  ;;  %v393_v61 = vadd.f32 %v1928_v13, %v267_v14  ;;  %v629_v9 = vmul.f32 %v574_v60, %v410_v34  ;;  %v2555_v14 = vld [vmem:[#allocation14_spill] sm:$0xff]  ;;  %v161_v60 = vmul.f32 %v2109_v42, %v2556_v41 }
 0x172   :  { %v624_v47 = vmul.f32 %v549_v0, %v405_v44  ;;  %v269_v0 = vadd.f32 %v251_v1, %v157_v55  ;;  %v270_v35 = vadd.f32 %v252_v11, %v158_v39  ;;  %v2560_v11 = vld [vmem:[#allocation11_spill] sm:$0xff] }
 0x173   :  { %v644_v46 = vadd.f32 %v643_v17, %v642_v40  ;;  %1152 = vrot.lane.b32.xlu1 %v2201_v38, %s1434_s12  ;;  %v394_v40 = vadd.f32 %v2069_v59, %v268_v52  ;;  %v411_v6 = vmax.f32 %v393_v61, 0.0  ;;  %v162_v52 = vmul.f32 %v2109_v42, %v2052_v31 }
 0x174   :  { %v645_v7 = vsel %vm639_vm0, %v624_v47, 0.0  ;;  %v651_v47 = vsel %vm639_vm0, %v627_v56, 0.0  ;;  %v395_v55 = vadd.f32 %v1933_v45, %v269_v0  ;;  %v396_v19 = vadd.f32 %v2072_v63, %v270_v35 }
 0x175   :  { %v646_v15 = vadd.f32 %v645_v7, %v644_v46  ;;  %v559_v54 = vpop.permute.xlu1 %558  ;;  %v594_v46 = vpop.permute.xlu0 %593  ;;  %v412_v58 = vmax.f32 %v394_v40, 0.0  ;;  %v2557_v7 = vld [vmem:[#allocation9_spill] sm:$0xff]  ;;  %v163_v31 = vmul.f32 %v2109_v42, %v2559_v10 }
 0x176   :  { %v626_v44 = vmul.f32 %v559_v54, %v407_v51  ;;  %v271_v51 = vadd.f32 %v253_v8, %v159_v32  ;;  %v255_v29 = vmul.f32 %v2113_v12, %v2557_v7  ;;  %v2558_v54 = vld [vmem:[#allocation15_spill] sm:$0xff]  ;;  %v413_v56 = vmax.f32 %v395_v55, 0.0 }
 0x177   :  { %v648_v5 = vadd.f32 %v647_v53, %v646_v15  ;;  %873 = vperm.xlu1 %1389, %v2003_v23   ;;  %v254_v23 = vmul.f32 %v2113_v12, %v2555_v14  ;;  %v631_v45 = vmul.f32 %v584_v33, %v412_v58  ;;  %v256_v63 = vmul.f32 %v2113_v12, %v2558_v54 }
 0x178   :  { %v649_v3 = vsel %vm639_vm0, %v626_v44, 0.0  ;;  %v397_v39 = vadd.f32 %v1938_v16, %v271_v51  ;;  %v414_v44 = vmax.f32 %v396_v19, 0.0  ;;  %v257_v33 = vmul.f32 %v2113_v12, %v2560_v11  ;;  %v941_v16 = vld [vmem:[%s2506_s6 + $0x8] sm:$0xff] }
 0x179   :  { %v650_v4 = vadd.f32 %v649_v3, %v648_v5  ;;  %v569_v17 = vpop.permute.xlu1 %568  ;;  %v272_v1 = vadd.f32 %v254_v23, %v160_v30  ;;  %v273_v61 = vadd.f32 %v255_v29, %v161_v60  ;;  %v604_v5 = vpop.permute.xlu0 %603  ;;  %v659_v40 = vsel %vm639_vm0, %v631_v45, 0.0 }
 0x17a   :  { %v628_v13 = vmul.f32 %v569_v17, %v409_v49  ;;  %v415_v0 = vmax.f32 %v397_v39, 0.0  ;;  %v275_v14 = vadd.f32 %v257_v33, %v163_v31 }
 0x17b   :  { %v652_v59 = vadd.f32 %v651_v47, %v650_v4  ;;  %881 = vperm.xlu1 %1389, %v2012_v25   ;;  %v655_v25 = vsel %vm639_vm0, %v629_v9, 0.0  ;;  %v398_v37 = vadd.f32 %v2075_v27, %v272_v1  ;;  %v633_v27 = vmul.f32 %v594_v46, %v414_v44 }
 0x17c   :  { %v653_v57 = vsel %vm639_vm0, %v628_v13, 0.0  ;;  %v2561_v4 = vmov 0   ;;  %v399_v42 = vadd.f32 %v1943_v18, %v273_v61  ;;  %v942_v13 = vld [vmem:[%s2506_s6 + $0x10] sm:$0xff]  ;;  %v401_v55 = vadd.f32 %v1948_v22, %v275_v14 }
 0x17d   :  { %v654_v48 = vadd.f32 %v653_v57, %v652_v59  ;;  %v579_v32 = vpop.permute.xlu1 %578  ;;  %v416_v12 = vmax.f32 %v398_v37, 0.0  ;;  %v663_v23 = vsel %vm639_vm0, %v633_v27, 0.0  ;;  %v614_v46 = vpop.permute.xlu0 %613 }
 0x17e   :  { %v630_v15 = vmul.f32 %v579_v32, %v411_v6  ;;  %v417_v18 = vmax.f32 %v399_v42, 0.0  ;;  %v419_v1 = vmax.f32 %v401_v55, 0.0 }
 0x17f   :  { %v656_v53 = vadd.f32 %v655_v25, %v654_v48  ;;  %889 = vperm.xlu1 %1389, %v2023_v50   ;;  %v274_v50 = vadd.f32 %v256_v63, %v162_v52  ;;  %v635_v6 = vmul.f32 %v604_v5, %v416_v12 }
 0x180   :  { %v657_v8 = vsel %vm639_vm0, %v630_v15, 0.0 }
 0x181   :  { %v658_v49 = vadd.f32 %v657_v8, %v656_v53  ;;  %v589_v34 = vpop.permute.xlu1 %588  ;;  %v400_v17 = vadd.f32 %v2082_v62, %v274_v50  ;;  %v667_v41 = vsel %vm639_vm0, %v635_v6, 0.0  ;;  %v684_v33 = vpop.permute.xlu0 %683 }
 0x182   :  { %v632_v3 = vmul.f32 %v589_v34, %v413_v56 }
 0x183   :  { %v660_v30 = vadd.f32 %v659_v40, %v658_v49  ;;  %1390 = vset.pattern.permute.xlu1 %v2561_v4  ;;  %v418_v62 = vmax.f32 %v400_v17, 0.0 }
 0x184   :  { %v661_v35 = vsel %vm639_vm0, %v632_v3, 0.0  ;;  %965 = vperm.xlu1 %1390, %v941_v16  }
 0x185   :  { %v662_v47 = vadd.f32 %v661_v35, %v660_v30  ;;  %v599_v9 = vpop.permute.xlu1 %598  ;;  %v637_v60 = vmul.f32 %v614_v46, %v418_v62  ;;  %v2274_v42 = vpop.permute.xlu0 %723  ;;  %v2562_v46 = vsub.s32 0, %v2086_v21 }
 0x186   :  { %v634_v51 = vmul.f32 %v599_v9, %v415_v0 }
 0x187   :  { %v664_v59 = vadd.f32 %v663_v23, %v662_v47  ;;  %v671_v25 = vsel %vm639_vm0, %v637_v60, 0.0 }
 0x188   :  { %v665_v58 = vsel %vm639_vm0, %v634_v51, 0.0  ;;  %970 = vperm.xlu1 %1390, %v942_v13  }
 0x189   :  { %v666_v19 = vadd.f32 %v665_v58, %v664_v59  ;;  %v609_v57 = vpop.permute.xlu1 %608  ;;  %v734_v17 = vpop.permute.xlu0 %733  ;;  %v2563_v58 = vsub.s32 1, %v2086_v21 }
 0x18a   :  { %v636_v7 = vmul.f32 %v609_v57, %v417_v18 }
 0x18b   :  { %v668_v29 = vadd.f32 %v667_v41, %v666_v19 }
 0x18c   :  { %v669_v48 = vsel %vm639_vm0, %v636_v7, 0.0 }
 0x18d   :  { %v670_v32 = vadd.f32 %v669_v48, %v668_v29  ;;  %v619_v52 = vpop.permute.xlu1 %618  ;;  %v744_v14 = vpop.permute.xlu0 %743 }
 0x18e   :  { %v638_v45 = vmul.f32 %v619_v52, %v419_v1 }
 0x18f   :  { %v672_v22 = vadd.f32 %v671_v25, %v670_v32 }
 0x190   :  { %v673_v15 = vsel %vm639_vm0, %v638_v45, 0.0 }
 0x191   :  { %v674_v54 = vadd.f32 %v673_v15, %v672_v22  ;;  %v719_v63 = vpop.permute.xlu1 %718  ;;  %v754_v18 = vpop.permute.xlu0 %753 }
 0x193   :  { %v675_v39 = vrot.slane %v674_v54, 4 }
 0x195   :  { %v676_v53 = vadd.f32 %v675_v39, %v674_v54  ;;  %v729_v56 = vpop.permute.xlu1 %728  ;;  %v764_v54 = vpop.permute.xlu0 %763 }
 0x197   :  { %v677_v44 = vrot.slane %v676_v53, 2 }
 0x199   :  { %v678_v37 = vadd.f32 %v677_v44, %v676_v53  ;;  %v739_v8 = vpop.permute.xlu1 %738 }
 0x19b   :  { %v679_v10 = vrot.slane %v678_v37, 1 }
 0x19d   :  { %v680_v31 = vadd.f32 %v679_v10, %v678_v37  ;;  %v749_v11 = vpop.permute.xlu1 %748 }
 0x19f   :  { %v686_v61 = vadd.f32 %v684_v33, %v680_v31 }
 0x1a1   :  { %v687_v5 = vsub.f32 0.0, %v686_v61  ;;  %v759_v49 = vpop.permute.xlu1 %758 }
 0x1a3   :  { %v688_v34 = vmul.f32 1.442695, %v687_v5  ;;  %v2565_v5 = vld [vmem:[#allocation18_spill] sm:$0xff] }
 0x1a5   :  { %1394 = vpow2.f32 %v688_v34  ;;  %v769_v16 = vpop.permute.xlu1 %768 }
 0x1a9   :  { %v779_v50 = vpop.permute.xlu1 %778 }
 0x1ad   :  { %v789_v40 = vpop.permute.xlu1 %788 }
 0x1b1   :  { %v799_v27 = vpop.permute.xlu1 %798 }
 0x1b2   :  { %v1395_v3 = vpop.eup %1394 }
 0x1b3   :  { %v690_v0 = vadd.f32 1.0, %v1395_v3 }
 0x1b5   :  { %1396 = vrcp.f32 %v690_v0 }
 0x1b6   :  { %v830_v30 = vpop.permute.xlu1 %829 }
 0x1ba   :  { %v838_v12 = vpop.permute.xlu1 %837 }
 0x1be   :  { %v842_v35 = vpop.permute.xlu1 %841 }
 0x1c2   :  { %v1397_v47 = vpop.eup %1396  ;;  %v850_v9 = vpop.permute.xlu1 %849 }
 0x1c3   :  { %v692_v13 = vsub.f32 1.0, %v1397_v47 }
 0x1c5   :  { %v694_v23 = vrot.slane %v692_v13, 7  ;;  %v1402_v13 = vld [vmem:[%s2507_s7 + $0x18] sm:$0xff] }
 0x1c6   :  { %v858_v6 = vpop.permute.xlu1 %857 }
 0x1c7   :  { %v2277_v51 = vsel %vm696_vm1, %v1397_v47, %v694_v23 }
 0x1c8   :  { %v2282_v59 = vrot.slane %v2277_v51, %v2562_v46  ;;  %v2289_v19 = vrot.slane %v2277_v51, %v2563_v58  ;;  %v946_v58 = vld [vmem:[%s2506_s6 + $0x30] sm:$0xff] }
 0x1ca   :  { %v812_v55 = vmul.f32 %v2282_v59, %v729_v56  ;;  %v814_v62 = vmul.f32 %v2282_v59, %v739_v8  ;;  %v866_v57 = vpop.permute.xlu1 %865  ;;  %v816_v41 = vmul.f32 %v2282_v59, %v749_v11  ;;  %v818_v60 = vmul.f32 %v2282_v59, %v759_v49 }
 0x1cb   :  { %v820_v7 = vmul.f32 %v2282_v59, %v769_v16  ;;  %v822_v29 = vmul.f32 %v2282_v59, %v779_v50  ;;  %v813_v1 = vmul.f32 %v2282_v59, %v734_v17  ;;  %v815_v48 = vmul.f32 %v2282_v59, %v744_v14  ;;  %v2566_v17 = vld [vmem:[#allocation27_spill] sm:$0xff] }
 0x1cc   :  { %v824_v32 = vmul.f32 %v2282_v59, %v789_v40  ;;  %v2299_v21 = vmul.f32 %v2282_v59, %v799_v27  ;;  %v817_v52 = vmul.f32 %v2282_v59, %v754_v18  ;;  %v904_v25 = vmul.f32 %v2289_v19, %v830_v30  ;;  %v944_v40 = vld [vmem:[%s2506_s6 + $0x20] sm:$0xff]  ;;  %v2568_v14 = vld [vmem:[#allocation19_spill] sm:$0xff] }
 0x1cd   :  { %v906_v45 = vmul.f32 %v2289_v19, %v838_v12  ;;  %v810_v22 = vmul.f32 %v2282_v59, %v719_v63  ;;  %v907_v39 = vmul.f32 %v2289_v19, %v842_v35  ;;  %v909_v53 = vmul.f32 %v2289_v19, %v850_v9  ;;  %v2564_v63 = vld [vmem:[#allocation17_spill] sm:$0xff]  ;;  %v2569_v18 = vld [vmem:[#allocation31_spill] sm:$0xff] }
 0x1ce   :  { %v1121_v15 = vpop.permute.xlu1 %1120  ;;  %v911_v56 = vmul.f32 %v2289_v19, %v858_v6  ;;  %v913_v44 = vmul.f32 %v2289_v19, %v866_v57  ;;  %v819_v37 = vmul.f32 %v2282_v59, %v764_v54  ;;  %v908_v33 = vmul.f32 %v2289_v19, %v2564_v63  ;;  %v949_v54 = vld [vmem:[%s2506_s6 + $0x48] sm:$0xff] }
 0x1cf   :  { %v2310_v8 = vadd.f32 %v904_v25, %v810_v22  ;;  %v1174_v10 = vsub.f32 %v2080_v43, %v1121_v15  ;;  %v2313_v31 = vadd.f32 %v906_v45, %v812_v55  ;;  %v2315_v11 = vadd.f32 %v907_v39, %v813_v1  ;;  %v2571_v1 = vld [vmem:[#allocation32_spill] sm:$0xff]  ;;  %v2572_v22 = vld [vmem:[#allocation21_spill] sm:$0xff] }
 0x1d0   :  { %v2319_v61 = vadd.f32 %v909_v53, %v815_v48  ;;  %v910_v49 = vmul.f32 %v2289_v19, %v2565_v5  ;;  %v2323_v16 = vadd.f32 %v911_v56, %v817_v52  ;;  %v912_v50 = vmul.f32 %v2289_v19, %v1915_v26  ;;  %v948_v52 = vld [vmem:[%s2506_s6 + $0x40] sm:$0xff]  ;;  %v1404_v45 = vld [vmem:[%s2507_s7 + $0x38] sm:$0xff]  ;;  %v1405_v63 = vld [vmem:[%s2507_s7 + $0x48] sm:$0xff] }
 0x1d1   :  { %1197 = vperm.xlu1 %1390, %v1174_v10   ;;  %v2331_v27 = vadd.f32 %v908_v33, %v814_v62  ;;  %v2337_v30 = vadd.f32 %v913_v44, %v819_v37  ;;  %v914_v12 = vmul.f32 %v2289_v19, %v1920_v2  ;;  %v916_v26 = vmul.f32 %v2289_v19, %v2566_v17  ;;  %v945_v2 = vld [vmem:[%s2506_s6 + $0x28] sm:$0xff]  ;;  %v950_v44 = vld [vmem:[%s2506_s6 + $0x50] sm:$0xff]  ;;  %v774_v37 = vpop.permute.xlu0 %773 }
 0x1d2   :  { %v1125_v34 = vpop.permute.xlu1 %1124  ;;  %v2333_v3 = vadd.f32 %v910_v49, %v816_v41  ;;  %v2335_v0 = vadd.f32 %v912_v50, %v818_v60  ;;  %v1177_v23 = vsub.f32 %v1402_v13, %v2568_v14  ;;  %v1403_v41 = vld [vmem:[%s2507_s7 + $0x28] sm:$0xff]  ;;  %v2570_v60 = vld [vmem:[#allocation20_spill] sm:$0xff]  ;;  %v1181_v15 = vsub.f32 %v1404_v45, %v2572_v22 }
 0x1d3   :  { %v1176_v43 = vsub.f32 %v2091_v28, %v1125_v34  ;;  %v2567_v28 = vld [vmem:[#allocation28_spill] sm:$0xff]  ;;  %v2345_v9 = vadd.f32 %v914_v12, %v820_v7  ;;  %v2354_v6 = vadd.f32 %v916_v26, %v822_v29  ;;  %v1179_v7 = vsub.f32 %v1403_v41, %v2570_v60  ;;  %v2573_v39 = vld [vmem:[#allocation33_spill] sm:$0xff]  ;;  %v2574_v33 = vld [vmem:[#allocation22_spill] sm:$0xff] }
 0x1d4   :  { %v918_v35 = vmul.f32 %v2289_v19, %v2567_v28  ;;  %v947_v29 = vld [vmem:[%s2506_s6 + $0x38] sm:$0xff]  ;;  %v1183_v5 = vsub.f32 %v1405_v63, %v2574_v33  ;;  %v952_v12 = vld [vmem:[%s2506_s6 + $0x60] sm:$0xff]  ;;  %v2576_v60 = vmov 1   ;;  %v1408_v22 = vld [vmem:[%s2507_s7 + $0x88] sm:$0xff] }
 0x1d5   :  { %1207 = vperm.xlu0 %1393, %v1176_v43   ;;  %980 = vperm.xlu1 %1390, %v944_v40   ;;  %v951_v49 = vld [vmem:[%s2506_s6 + $0x58] sm:$0xff]  ;;  %v821_v43 = vmul.f32 %v2282_v59, %v774_v37  ;;  %v784_v17 = vpop.permute.xlu0 %783  ;;  %v1192_v37 = vld [vmem:[%s2508_s8] sm:$0x1]  ;;  %v1193_v63 = vld [vmem:[%s2508_s8 + $0x1] sm:$0x1] }
 0x1d6   :  { %v1129_v47 = vpop.permute.xlu1 %1128  ;;  %v2356_v46 = vadd.f32 %v918_v35, %v824_v32  ;;  %v2575_v35 = vld [vmem:[#allocation23_spill] sm:$0xff]  ;;  %v823_v13 = vmul.f32 %v2282_v59, %v784_v17  ;;  %v1194_v33 = vsub.f32 %v1192_v37, %v1193_v63 }
 0x1d7   :  { %v1178_v55 = vsub.f32 %v2569_v18, %v1129_v47  ;;  %v955_v45 = vld [vmem:[%s2506_s6 + $0x78] sm:$0xff] }
 0x1d9   :  { %1212 = vperm.xlu0 %1393, %v1177_v23   ;;  %985 = vperm.xlu1 %1390, %v945_v2   ;;  %v953_v23 = vld [vmem:[%s2506_s6 + $0x68] sm:$0xff]  ;;  %v794_v18 = vpop.permute.xlu0 %793 }
 0x1da   :  { %v1133_v62 = vpop.permute.xlu1 %1132 }
 0x1db   :  { %v1180_v48 = vsub.f32 %v2571_v1, %v1133_v62  ;;  %v954_v62 = vld [vmem:[%s2506_s6 + $0x70] sm:$0xff] }
 0x1dd   :  { %1217 = vperm.xlu0 %1393, %v1178_v55   ;;  %990 = vperm.xlu1 %1390, %v946_v58   ;;  %v825_v58 = vmul.f32 %v2282_v59, %v794_v18 }
 0x1de   :  { %v1137_v57 = vpop.permute.xlu1 %1136 }
 0x1df   :  { %v1182_v53 = vsub.f32 %v2573_v39, %v1137_v57 }
 0x1e1   :  { %1222 = vperm.xlu0 %1393, %v1179_v7   ;;  %995 = vperm.xlu1 %1390, %v947_v29   ;;  %v956_v7 = vld [vmem:[%s2506_s6 + $0x80] sm:$0xff]  ;;  %v2577_v29 = vld [vmem:[#allocation30_spill] sm:$0xff] }
 0x1e2   :  { %v1141_v32 = vpop.permute.xlu1 %1140 }
 0x1e3   :  { %v1184_v34 = vsub.f32 %v2144_v20, %v1141_v32  ;;  %v1406_v20 = vld [vmem:[%s2507_s7 + $0x58] sm:$0xff]  ;;  %v2578_v32 = vld [vmem:[#allocation25_spill] sm:$0xff] }
 0x1e4   :  { %v1185_v47 = vsub.f32 %v1406_v20, %v2575_v35 }
 0x1e5   :  { %1227 = vperm.xlu0 %1393, %v1180_v48   ;;  %1000 = vperm.xlu1 %1390, %v948_v52   ;;  %v1407_v48 = vld [vmem:[%s2507_s7 + $0x78] sm:$0xff] }
 0x1e6   :  { %v1145_v25 = vpop.permute.xlu1 %1144  ;;  %v1189_v52 = vsub.f32 %v1407_v48, %v2578_v32 }
 0x1e7   :  { %v1186_v1 = vsub.f32 %v2165_v24, %v1145_v25  ;;  %v2579_v24 = vld [vmem:[#allocation26_spill] sm:$0xff] }
 0x1e8   :  { %v1191_v25 = vsub.f32 %v1408_v22, %v2579_v24 }
 0x1e9   :  { %1232 = vperm.xlu0 %1393, %v1181_v15   ;;  %1005 = vperm.xlu1 %1390, %v949_v54   ;;  %v1409_v15 = vld [vmem:[%s2507_s7 + $0x68] sm:$0xff]  ;;  %v2580_v54 = vld [vmem:[#allocation24_spill] sm:$0xff] }
 0x1ea   :  { %v1149_v56 = vpop.permute.xlu1 %1148 }
 0x1eb   :  { %v1188_v39 = vsub.f32 %v2180_v36, %v1149_v56  ;;  %v2450_v36 = vpop.permute.xlu0 %803  ;;  %v811_v56 = vmul.f32 %v2282_v59, %v2274_v42 }
 0x1ed   :  { %1237 = vperm.xlu0 %1393, %v1182_v53   ;;  %1010 = vperm.xlu1 %1390, %v950_v44   ;;  %v957_v53 = vld [vmem:[%s2506_s6 + $0x88] sm:$0xff]  ;;  %s1435_s6 = smov [#allocation2]  }
 0x1ee   :  { %v1153_v10 = vpop.permute.xlu1 %1152  ;;  %s1373_s7 = sshll.u32 %s1435_s6, 4  ;;  %s1374_s7 = int_to_ptr.vmem [resolvable:$true] %s1373_s7 }
 0x1ef   :  { %v1190_v44 = vsub.f32 %v2201_v38, %v1153_v10  ;;  %v961_v10 = vpop.permute.xlu0 %960  ;;  %s1410_s8 = scalar_lea.vmem %s1374_s7, 64  ;;  %p1415_p1 = scmp.lt.s32.totalorder %s1374_s7, %s1374_s7 }
 0x1f0   :  { %p1411_p0 = scmp.ne.s32.totalorder %s1374_s7, %s1410_s8  ;;  %p1416_p2 = scmp.lt.s32.totalorder %s1410_s8, %s1410_s8 }
 0x1f1   :  { %1242 = vperm.xlu0 %1393, %v1183_v5   ;;  %1015 = vperm.xlu1 %1390, %v951_v49   ;;  %v2581_v5 = vld [vmem:[#allocation16_spill] sm:$0xff] }
 0x1f2   :  { %v874_v50 = vpop.permute.xlu1 %873  ;;  %v905_v38 = vmul.f32 %v2289_v19, %v2581_v5  ;;  %p1417_p3 = por %p1416_p2, %p1415_p1 }
 0x1f3   :  { %v915_v40 = vmul.f32 %v2289_v19, %v874_v50 }
 0x1f4   :  { %p1418_p4 = pnand %p1417_p3, %p1411_p0 }
 0x1f5   :  { %1247 = vperm.xlu0 %1393, %v1184_v34   ;;  %v2397_v26 = vadd.f32 %v915_v40, %v821_v43  ;;  %1020 = vperm.xlu1 %1390, %v952_v12   ;;  %v923_v34 = vadd.f32 %v905_v38, %v811_v56  ;;  %v976_v43 = vpop.permute.xlu0 %975  ;;  %v1048_v40 = vadd.f32 %v961_v10, %v2310_v8 }
 0x1f6   :  { %v882_v28 = vpop.permute.xlu1 %881  ;;  %v1051_v42 = vadd.f32 %v976_v43, %v2315_v11 }
 0x1f7   :  { %v917_v14 = vmul.f32 %v2289_v19, %v882_v28  ;;  %v1066_v35 = vmax.f32 %v1048_v40, 0.0 }
 0x1f9   :  { %1252 = vperm.xlu0 %1393, %v1185_v47   ;;  %v2408_v2 = vadd.f32 %v917_v14, %v823_v13  ;;  %1025 = vperm.xlu1 %1390, %v953_v23   ;;  %v1203_v28 = vpop.permute.xlu0 %1202 }
 0x1fa   :  { %v890_v55 = vpop.permute.xlu1 %889 }
 0x1fb   :  { %v919_v57 = vmul.f32 %v2289_v19, %v890_v55 }
 0x1fd   :  { %1030 = vperm.xlu0 %1393, %v954_v62   ;;  %v2415_v41 = vadd.f32 %v919_v57, %v825_v58  ;;  %1391 = vset.pattern.permute.xlu1 %v2576_v60  ;;  %v1069_v60 = vmax.f32 %v1051_v42, 0.0 }
 0x1fe   :  { %893 = vperm.xlu1 %1391, %v2577_v29  }
 0x1ff   :  { %v966_v49 = vpop.permute.xlu1 %965 }
 0x200   :  { %v1049_v50 = vadd.f32 %v966_v49, %v923_v34 }
 0x201   :  { %1040 = vperm.xlu0 %1393, %v956_v7  }
 0x202   :  { %1392 = vset.pattern.permute.xlu1 %v2561_v4  ;;  %v1187_v4 = vsub.f32 %v1409_v15, %v2580_v54  ;;  %v1067_v12 = vmax.f32 %v1049_v50, 0.0 }
 0x203   :  { %1257 = vperm.xlu1 %1392, %v1186_v1   ;;  %v971_v17 = vpop.permute.xlu1 %970 }
 0x204   :  { %v1050_v20 = vadd.f32 %v971_v17, %v2313_v31  ;;  %v1286_v47 = vmul.f32 %v1203_v28, %v1067_v12 }
 0x205   :  { %1272 = vperm.xlu0 %1393, %v1189_v52  }
 0x206   :  { %v1068_v23 = vmax.f32 %v1050_v20, 0.0  ;;  %v1304_v55 = vsel %vm639_vm0, %v1286_v47, 0.0 }
 0x207   :  { %1035 = vperm.xlu1 %1392, %v955_v45  }
 0x209   :  { %1282 = vperm.xlu0 %1393, %v1191_v25  }
 0x20b   :  { %1262 = vperm.xlu1 %1392, %v1187_v4  }
 0x20f   :  { %1267 = vperm.xlu1 %1392, %v1188_v39  }
 0x213   :  { %1045 = vperm.xlu1 %1392, %v957_v53  }
 0x217   :  { %1277 = vperm.xlu1 %1392, %v1190_v44  }
 0x21b   :  { %1346 = vperm.xlu1 %1392, %v1194_v33  }
 0x24c   :  { %v1198_v13 = vpop.permute.xlu1 %1197 }
 0x24d   :  { %v1285_v14 = vmul.f32 %v1198_v13, %v1066_v35 }
 0x24f   :  { %v1303_v18 = vsel %vm639_vm0, %v1285_v14, 0.0 }
 0x250   :  { %v1208_v62 = vpop.permute.xlu0 %1207  ;;  %v1305_v58 = vadd.f32 %v1304_v55, %v1303_v18  ;;  %v981_v57 = vpop.permute.xlu1 %980 }
 0x251   :  { %v1287_v8 = vmul.f32 %v1208_v62, %v1068_v23  ;;  %v1052_v7 = vadd.f32 %v981_v57, %v2331_v27 }
 0x253   :  { %v1306_v31 = vsel %vm639_vm0, %v1287_v8, 0.0  ;;  %v1070_v52 = vmax.f32 %v1052_v7, 0.0 }
 0x254   :  { %v1307_v29 = vadd.f32 %v1306_v31, %v1305_v58  ;;  %v1213_v1 = vpop.permute.xlu0 %1212  ;;  %v986_v48 = vpop.permute.xlu1 %985 }
 0x255   :  { %v1288_v32 = vmul.f32 %v1213_v1, %v1069_v60  ;;  %v1053_v11 = vadd.f32 %v986_v48, %v2319_v61 }
 0x257   :  { %v1308_v45 = vsel %vm639_vm0, %v1288_v32, 0.0  ;;  %v1071_v54 = vmax.f32 %v1053_v11, 0.0 }
 0x258   :  { %v1309_v22 = vadd.f32 %v1308_v45, %v1307_v29  ;;  %v1218_v24 = vpop.permute.xlu0 %1217  ;;  %v991_v25 = vpop.permute.xlu1 %990 }
 0x259   :  { %v1289_v15 = vmul.f32 %v1218_v24, %v1070_v52  ;;  %v1054_v4 = vadd.f32 %v991_v25, %v2333_v3 }
 0x25b   :  { %v1310_v27 = vsel %vm639_vm0, %v1289_v15, 0.0  ;;  %v1072_v63 = vmax.f32 %v1054_v4, 0.0 }
 0x25c   :  { %v1311_v39 = vadd.f32 %v1310_v27, %v1309_v22  ;;  %v1223_v53 = vpop.permute.xlu0 %1222  ;;  %v996_v44 = vpop.permute.xlu1 %995 }
 0x25d   :  { %v1290_v37 = vmul.f32 %v1223_v53, %v1071_v54  ;;  %v1055_v33 = vadd.f32 %v996_v44, %v2323_v16 }
 0x25f   :  { %v1312_v61 = vsel %vm639_vm0, %v1290_v37, 0.0  ;;  %v1073_v49 = vmax.f32 %v1055_v33, 0.0 }
 0x260   :  { %v1313_v56 = vadd.f32 %v1312_v61, %v1311_v39  ;;  %v1228_v5 = vpop.permute.xlu0 %1227  ;;  %v1001_v38 = vpop.permute.xlu1 %1000 }
 0x261   :  { %v1291_v10 = vmul.f32 %v1228_v5, %v1072_v63  ;;  %v1056_v34 = vadd.f32 %v1001_v38, %v2335_v0 }
 0x263   :  { %v1314_v3 = vsel %vm639_vm0, %v1291_v10, 0.0  ;;  %v1074_v17 = vmax.f32 %v1056_v34, 0.0 }
 0x264   :  { %v1315_v50 = vadd.f32 %v1314_v3, %v1313_v56  ;;  %v1233_v43 = vpop.permute.xlu0 %1232  ;;  %v1006_v40 = vpop.permute.xlu1 %1005 }
 0x265   :  { %v1292_v12 = vmul.f32 %v1233_v43, %v1073_v49  ;;  %v1057_v28 = vadd.f32 %v1006_v40, %v2337_v30 }
 0x267   :  { %v1316_v16 = vsel %vm639_vm0, %v1292_v12, 0.0  ;;  %v1075_v14 = vmax.f32 %v1057_v28, 0.0 }
 0x268   :  { %v1317_v20 = vadd.f32 %v1316_v16, %v1315_v50  ;;  %v1238_v35 = vpop.permute.xlu0 %1237  ;;  %v1011_v47 = vpop.permute.xlu1 %1010 }
 0x269   :  { %v1293_v13 = vmul.f32 %v1238_v35, %v1074_v17  ;;  %v1058_v42 = vadd.f32 %v1011_v47, %v2345_v9 }
 0x26b   :  { %v1318_v0 = vsel %vm639_vm0, %v1293_v13, 0.0  ;;  %v1076_v58 = vmax.f32 %v1058_v42, 0.0 }
 0x26c   :  { %v1319_v23 = vadd.f32 %v1318_v0, %v1317_v20  ;;  %v1243_v18 = vpop.permute.xlu0 %1242  ;;  %v1016_v55 = vpop.permute.xlu1 %1015 }
 0x26d   :  { %v1294_v62 = vmul.f32 %v1243_v18, %v1075_v14  ;;  %v1059_v57 = vadd.f32 %v1016_v55, %v2397_v26 }
 0x26f   :  { %v1320_v30 = vsel %vm639_vm0, %v1294_v62, 0.0  ;;  %v1077_v29 = vmax.f32 %v1059_v57, 0.0 }
 0x270   :  { %v1321_v8 = vadd.f32 %v1320_v30, %v1319_v23  ;;  %v1248_v60 = vpop.permute.xlu0 %1247  ;;  %v1021_v7 = vpop.permute.xlu1 %1020 }
 0x271   :  { %v1295_v31 = vmul.f32 %v1248_v60, %v1076_v58  ;;  %v1060_v22 = vadd.f32 %v1021_v7, %v2354_v6 }
 0x273   :  { %v1322_v1 = vsel %vm639_vm0, %v1295_v31, 0.0  ;;  %v1078_v15 = vmax.f32 %v1060_v22, 0.0 }
 0x274   :  { %v1323_v48 = vadd.f32 %v1322_v1, %v1321_v8  ;;  %v1253_v9 = vpop.permute.xlu0 %1252  ;;  %v1026_v32 = vpop.permute.xlu1 %1025 }
 0x275   :  { %v1296_v52 = vmul.f32 %v1253_v9, %v1077_v29  ;;  %v1061_v39 = vadd.f32 %v1026_v32, %v2408_v2  ;;  %v2582_v2 = vld [vmem:[#allocation29_spill] sm:$0xff] }
 0x276   :  { %v921_v34 = vmul.f32 %v2289_v19, %v2582_v2 }
 0x277   :  { %v1324_v11 = vsel %vm639_vm0, %v1296_v52, 0.0  ;;  %v1079_v61 = vmax.f32 %v1061_v39, 0.0 }
 0x278   :  { %v1325_v45 = vadd.f32 %v1324_v11, %v1323_v48  ;;  %v1031_v54 = vpop.permute.xlu0 %1030 }
 0x279   :  { %v894_v24 = vpop.permute.xlu1 %893  ;;  %v1062_v6 = vadd.f32 %v1031_v54, %v2356_v46 }
 0x27a   :  { %v920_v26 = vmul.f32 %v2289_v19, %v894_v24 }
 0x27b   :  { %v1080_v10 = vmax.f32 %v1062_v6, 0.0 }
 0x27c   :  { %v938_v25 = vadd.f32 %v920_v26, %v2299_v21  ;;  %v1041_v33 = vpop.permute.xlu0 %1040  ;;  %v827_v21 = vmul.f32 %v2282_v59, %v2450_v36 }
 0x27e   :  { %v1258_v4 = vpop.permute.xlu1 %1257  ;;  %v1064_v12 = vadd.f32 %v1041_v33, %v938_v25  ;;  %v939_v17 = vadd.f32 %v921_v34, %v827_v21 }
 0x27f   :  { %v1297_v27 = vmul.f32 %v1258_v4, %v1078_v15 }
 0x280   :  { %v1273_v3 = vpop.permute.xlu0 %1272  ;;  %v1082_v35 = vmax.f32 %v1064_v12, 0.0 }
 0x281   :  { %v1326_v53 = vsel %vm639_vm0, %v1297_v27, 0.0 }
 0x282   :  { %v1327_v44 = vadd.f32 %v1326_v53, %v1325_v45  ;;  %v1036_v37 = vpop.permute.xlu1 %1035  ;;  %v1361_v45 = vrot.slane %v2277_v51, 6 }
 0x283   :  { %v1063_v63 = vadd.f32 %v1036_v37, %v2415_v41 }
 0x284   :  { %v1283_v13 = vpop.permute.xlu0 %1282 }
 0x285   :  { %v1081_v5 = vmax.f32 %v1063_v63, 0.0 }
 0x286   :  { %v1263_v56 = vpop.permute.xlu1 %1262 }
 0x287   :  { %v1298_v38 = vmul.f32 %v1263_v56, %v1079_v61  ;;  %v1300_v41 = vmul.f32 %v1273_v3, %v1081_v5 }
 0x289   :  { %v1328_v49 = vsel %vm639_vm0, %v1298_v38, 0.0  ;;  %v1332_v20 = vsel %vm639_vm0, %v1300_v41, 0.0 }
 0x28a   :  { %v1329_v50 = vadd.f32 %v1328_v49, %v1327_v44  ;;  %v1268_v43 = vpop.permute.xlu1 %1267 }
 0x28b   :  { %v1299_v40 = vmul.f32 %v1268_v43, %v1080_v10 }
 0x28d   :  { %v1330_v46 = vsel %vm639_vm0, %v1299_v40, 0.0 }
 0x28e   :  { %v1331_v28 = vadd.f32 %v1330_v46, %v1329_v50  ;;  %v1046_v16 = vpop.permute.xlu1 %1045 }
 0x28f   :  { %v1065_v59 = vadd.f32 %v1046_v16, %v939_v17 }
 0x290   :  { %v1333_v36 = vadd.f32 %v1332_v20, %v1331_v28 }
 0x291   :  { %v1083_v47 = vmax.f32 %v1065_v59, 0.0 }
 0x292   :  { %v1278_v14 = vpop.permute.xlu1 %1277 }
 0x293   :  { %v1302_v19 = vmul.f32 %v1283_v13, %v1083_v47  ;;  %v1301_v42 = vmul.f32 %v1278_v14, %v1082_v35 }
 0x295   :  { %v1334_v0 = vsel %vm639_vm0, %v1301_v42, 0.0  ;;  %v1336_v18 = vsel %vm639_vm0, %v1302_v19, 0.0 }
 0x296   :  { %v1335_v23 = vadd.f32 %v1334_v0, %v1333_v36  ;;  %v1347_v7 = vpop.permute.xlu1 %1346 }
 0x298   :  { %v1337_v55 = vadd.f32 %v1336_v18, %v1335_v23 }
 0x29a   :  { %v1338_v62 = vrot.slane %v1337_v55, 4 }
 0x29c   :  { %v1339_v58 = vadd.f32 %v1338_v62, %v1337_v55 }
 0x29e   :  { %v1340_v57 = vrot.slane %v1339_v58, 2 }
 0x2a0   :  { %v1341_v30 = vadd.f32 %v1340_v57, %v1339_v58 }
 0x2a2   :  { %v1342_v8 = vrot.slane %v1341_v30, 1 }
 0x2a4   :  { %v1343_v60 = vadd.f32 %v1342_v8, %v1341_v30 }
 0x2a6   :  { %v1349_v31 = vadd.f32 %v1347_v7, %v1343_v60 }
 0x2a8   :  { %v1350_v29 = vsub.f32 0.0, %v1349_v31 }
 0x2aa   :  { %v1351_v1 = vmul.f32 1.442695, %v1350_v29 }
 0x2ac   :  { %1398 = vpow2.f32 %v1351_v1 }
 0x2b9   :  { %v1399_v48 = vpop.eup %1398 }
 0x2ba   :  { %v1353_v9 = vadd.f32 1.0, %v1399_v48 }
 0x2bc   :  { %1400 = vrcp.f32 %v1353_v9 }
 0x2c9   :  { %v1401_v32 = vpop.eup %1400 }
 0x2ca   :  { %v1355_v52 = vsub.f32 1.0, %v1401_v32 }
 0x2cc   :  { %v1357_v11 = vrot.slane %v1355_v52, 7 }
 0x2ce   :  { %v1359_v22 = vsel %vm696_vm1, %v1401_v32, %v1357_v11 }
 0x2cf   :  { %v1364_v24 = vsel %vm1363_vm2, %v1359_v22, %v1361_v45 }
 0x2d0   :  { %1366 = vst.msk [vmem:[#allocation2] sm:$0xf] %vm1365_vm3, %v1364_v24 }
 0x2d1   :  { %1421 = shalt.err (!%p1418_p4)
}
 0x2d2   :  { %1376 = dma.vmem_to_hbm [thread:$0]  %s1374_s7, 64, %s2509_s9, [#allocation3]  }
 0x2d3   :  { %1430 = dma.done.wait [#allocation3], 64  }
 0x2d4   :  { %1431 = vsyncadd [#allocation3], 4294967232 }
 0x2d5   :  { %1380 = vsyncpa [#allocation3], 1 }

</bundles_post_ra>
